<compile_context>
chip_gen: v7x
topology: tpu7x:2x2x1
jax: 0.10.0
libtpu: 0.0.40
codegen_flags: <defaults>
</compile_context>

<pallas_src>
import functools
import math

import jax
import jax.numpy as jnp
from jax import lax
from jax.experimental import pallas as pl
from jax.experimental.pallas import tpu as pltpu


def _round_up(v, m):
    return ((v + m - 1) // m) * m


# ---------------------------------------------------------------------------
# Conv2d_rd weight transform (theta branch), plain-JAX weight-space glue.
# ---------------------------------------------------------------------------
def rd_weight(w5, theta=1.0):
    """w5: (C_out, C_in, 5, 5) -> re-arranged (C_out, C_in, 5, 5)."""
    co, ci = w5.shape[0], w5.shape[1]
    wf = w5.reshape(co, ci, 25)
    idx_a = jnp.array([0, 2, 4, 10, 14, 20, 22, 24])
    idx_b = jnp.array([6, 7, 8, 11, 13, 16, 17, 18])
    out = jnp.zeros_like(wf)
    out = out.at[:, :, idx_a].set(wf[:, :, idx_a] - wf[:, :, idx_b] * theta)
    out = out.at[:, :, idx_b].set(wf[:, :, idx_b] - wf[:, :, 12:13] * theta)
    out = out.at[:, :, 12].set(wf[:, :, 12] * (1.0 - theta))
    return out.reshape(co, ci, 5, 5)


def _vmem_capacity_bytes():
    """Physical per-core VMEM (generation aware); conservative fallback."""
    try:
        info = pltpu.get_tpu_info()
        cap = getattr(info, "vmem_capacity_bytes", None)
        if cap:
            return int(cap)
    except Exception:
        pass
    return 64 << 20  # v7x per-core size (safe lower bound)


# ---------------------------------------------------------------------------
# Pallas kernel.  Grid = (N, C // C_tile); channel axis is a reduction.
# ---------------------------------------------------------------------------
def _dsa_kernel(x_ref, w_ref, b_ref, o_ref, pad_ref, *,
                C, C_tile, H, W, Hr, HP, WB, TR, n_tiles):
    # x_ref  : (1, C_tile, H, W)  VMEM  input channel tile (any float dtype)
    # w_ref  : (98,)              SMEM  merged 7x7 weights, order [c, ky, kx]
    # b_ref  : (1,)               SMEM  merged bias (b7 + b5)
    # o_ref  : (1, HO, WB)        VMEM  lane-dense output (cols >= W are junk)
    # pad_ref: (2, HP, WB)        VMEM  pooled accumulators / zero-haloed slabs
    k = pl.program_id(1)
    last_k = pl.num_programs(1) - 1

    # ---- init the pooled sum / max accumulators at the first C step --------
    @pl.when(k == 0)
    def _():
        pad_ref[0, 0:Hr, :] = jnp.zeros((Hr, WB), jnp.float32)
        pad_ref[1, 0:Hr, :] = jnp.full((Hr, WB), -jnp.inf, jnp.float32)

    # ---- fused channel sum + max over this C tile (fori_loop, f32 accum) ---
    def pool_body(c, carry):
        s, m = carry
        v = x_ref[0, c].astype(jnp.float32)
        return s + v, jnp.maximum(m, v)

    s0 = jnp.zeros((H, W), jnp.float32)
    m0 = jnp.full((H, W), -jnp.inf, jnp.float32)
    s, m = lax.fori_loop(0, C_tile, pool_body, (s0, m0),
                         unroll=min(8, C_tile))
    pad_ref[0, 0:H, 0:W] = pad_ref[0, 0:H, 0:W] + s
    pad_ref[1, 0:H, 0:W] = jnp.maximum(pad_ref[1, 0:H, 0:W], m)

    # ---- last C step: build zero-haloed slabs + merged 7x7 conv + sigmoid --
    @pl.when(k == last_k)
    def _():
        inv_c = jnp.float32(1.0 / C)
        s_all = pad_ref[0, 0:Hr, :]
        m_all = pad_ref[1, 0:Hr, :]
        rows = lax.broadcasted_iota(jnp.int32, (Hr, WB), 0)
        cols = lax.broadcasted_iota(jnp.int32, (Hr, WB), 1)
        valid = (rows < H) & (cols < W)
        avg = jnp.where(valid, s_all * inv_c, 0.0)
        mx = jnp.where(valid, m_all, 0.0)

        # Zero-haloed slabs with the image at row offset 3: one full-width
        # unmasked store per channel (concat + XLU sublane roll, zeros wrap).
        zrows = jnp.zeros((HP - Hr, WB), jnp.float32)
        pad_ref[0] = pltpu.roll(jnp.concatenate([avg, zrows], axis=0), 3, axis=0)
        pad_ref[1] = pltpu.roll(jnp.concatenate([mx, zrows], axis=0), 3, axis=0)

        # Hoist all SMEM weight reads out of the MAC loops.
        ws = [[[w_ref[c * 49 + a * 7 + b] for b in range(7)]
               for a in range(7)] for c in range(2)]
        bias = b_ref[0]
        TS = TR + 8

        # Row-tiled merged conv:
        #   out[r0+i, j] = sum_{c,a,b} w[c,a,b] * P[c, r0+i+a, (j+b-3) % WB]
        # with P the zero-haloed pooled image (row offset 3).  Per tile we
        # keep 7 (TS, WB) dy-partials -> they stay in vregs.
        def conv_tile(t, _):
            r0 = pl.multiple_of(t * TR, 8)
            parts = [jnp.zeros((TS, WB), jnp.float32) for _ in range(7)]
            for c in range(2):
                slab = pad_ref[c, pl.ds(r0, TS), :]
                for b in range(7):
                    # lane roll (XLU): column j picks P[.., (j + b - 3) % WB]
                    lrl = slab if b == 3 else pltpu.roll(slab, (3 - b) % WB, axis=1)
                    for a in range(7):
                        parts[a] = parts[a] + ws[c][a][b] * lrl
            acc = parts[0]                       # a == 0: zero sublane shift
            for a in range(1, 7):
                acc = acc + pltpu.roll(parts[a], (TS - a) % TS, axis=0)
            o_ref[0, pl.ds(r0, TR), :] = jax.nn.sigmoid(acc[0:TR, :] + bias)
            return 0

        lax.fori_loop(0, n_tiles, conv_tile, 0)


# ---------------------------------------------------------------------------
# Wrapper
# ---------------------------------------------------------------------------
def dsa_forward(x, w7, b7, w5, b5, theta=1.0):
    N, C, H, W = x.shape

    # --- weight-space glue: Conv2d_rd transform + merge 5x5 into the 7x7 ----
    w5_eff = w5 if abs(theta) < 1e-8 else rd_weight(w5, theta)
    wc = w7[0].astype(jnp.float32)                                  # (2, 7, 7)
    wc = wc.at[:, 1:6, 1:6].add(w5_eff[0].astype(jnp.float32))      # pad2->pad3
    w_flat = wc.reshape(-1)                                         # (98,)
    b = (b7[0] + b5[0]).astype(jnp.float32).reshape(1)              # (1,)

    # --- geometry ------------------------------------------------------------
    Hr = _round_up(H, 8)                  # sublane-aligned pooled-map height
    WB = _round_up(W + 3, 128)            # lane-aligned width incl. 3-col halo
    # Row-tile size: keep ~9 live (TR+8, WB) f32 slabs near the vreg budget.
    tr = ((56 * 1024) // (9 * WB) - 8) // 8 * 8
    TR = int(max(8, min(tr, 64, Hr)))
    HO = _round_up(Hr, TR)                # output rows actually stored
    n_tiles = HO // TR
    HP = HO + 8                           # scratch rows (halo + tile slack)

    # --- channel tiling: bounds VMEM regardless of C -------------------------
    isize = jnp.dtype(x.dtype).itemsize
    per_ch = Hr * _round_up(W, 128) * isize        # padded VMEM bytes / channel
    c_tile = max(1, min(C, (8 << 20) // (2 * per_ch)))
    while C % c_tile:                              # divisor -> no partial block
        c_tile -= 1
    n_csteps = C // c_tile

    # --- VMEM budget (generation aware) --------------------------------------
    in_block = c_tile * per_ch
    out_block = HO * WB * 4
    scratch = 2 * HP * WB * 4
    est = 2 * (in_block + out_block) + scratch + (2 << 20)
    vmem_cap = _vmem_capacity_bytes()              # 128 MiB v5e/v6e, 64 MiB v7x
    vmem_limit = int(min(max(est, 32 << 20), (vmem_cap * 7) // 8))

    kernel = functools.partial(
        _dsa_kernel, C=C, C_tile=c_tile, H=H, W=W, Hr=Hr, HP=HP, WB=WB,
        TR=TR, n_tiles=n_tiles)

    out_full = pl.pallas_call(
        kernel,
        out_shape=jax.ShapeDtypeStruct((N, HO, WB), jnp.float32),
        grid_spec=pltpu.PrefetchScalarGridSpec(
            num_scalar_prefetch=0,
            grid=(N, n_csteps),
            in_specs=[
                pl.BlockSpec((1, c_tile, H, W), lambda n, k: (n, k, 0, 0)),
                pl.BlockSpec(memory_space=pltpu.MemorySpace.SMEM),
                pl.BlockSpec(memory_space=pltpu.MemorySpace.SMEM),
            ],
            out_specs=pl.BlockSpec((1, HO, WB), lambda n, k: (n, 0, 0)),
            scratch_shapes=[pltpu.VMEM((2, HP, WB), jnp.float32)],
        ),
        compiler_params=pltpu.CompilerParams(
            dimension_semantics=("parallel", "arbitrary"),
            vmem_limit_bytes=vmem_limit,
        ),
    )(x, w_flat, b)     # x keeps its HBM dtype (bf16 stays bf16 on the wire)

    # Crop lane/row padding and restore (N, 1, H, W).
    return out_full[:, :H, :W].reshape(N, 1, H, W)


# ---------------------------------------------------------------------------
# Pure-JAX reference (for correctness check).
# NOTE: validates the kernel against the same rd_weight transform; a one-time
# cross-check against the actual PyTorch Conv2d_rd outputs is still advised.
# ---------------------------------------------------------------------------
def dsa_ref(x, w7, b7, w5, b5, theta=1.0):
    avg = jnp.mean(x, axis=1, keepdims=True)
    mx = jnp.max(x, axis=1, keepdims=True)
    xm = jnp.concatenate([avg, mx], axis=1)
    dn = ("NCHW", "OIHW", "NCHW")
    w5_eff = w5 if abs(theta) < 1e-8 else rd_weight(w5, theta)
    x1 = lax.conv_general_dilated(xm, w7, (1, 1), [(3, 3), (3, 3)],
                                  dimension_numbers=dn) + b7.reshape(1, -1, 1, 1)
    x2 = lax.conv_general_dilated(xm, w5_eff, (1, 1), [(2, 2), (2, 2)],
                                  dimension_numbers=dn) + b5.reshape(1, -1, 1, 1)
    return jax.nn.sigmoid(x1 + x2)


if __name__ == "__main__":
    key = jax.random.PRNGKey(0)
    k_x, k_w7, k_b7, k_w5, k_b5 = jax.random.split(key, 5)

    N, C, H, W = 2, 4, 16, 16
    x = jax.random.normal(k_x, (N, C, H, W), dtype=jnp.float32)

    # Deterministic parameter init (PyTorch-like uniform fan-in bounds).
    bound7 = 1.0 / math.sqrt(2 * 7 * 7)
    w7 = jax.random.uniform(k_w7, (1, 2, 7, 7), jnp.float32, -bound7, bound7)
    b7 = jax.random.uniform(k_b7, (1,), jnp.float32, -bound7, bound7)
    bound5 = 1.0 / math.sqrt(2 * 5 * 5)
    w5 = jax.random.uniform(k_w5, (1, 2, 5, 5), jnp.float32, -bound5, bound5)
    b5 = jax.random.uniform(k_b5, (1,), jnp.float32, -bound5, bound5)

    out = dsa_forward(x, w7, b7, w5, b5, theta=1.0)
    out = jax.block_until_ready(out)

    ref = dsa_ref(x, w7, b7, w5, b5, theta=1.0)
    assert out.shape == (N, 1, H, W)
    max_diff = float(jnp.max(jnp.abs(out - ref)))
    assert max_diff < 1e-5, f"max abs diff {max_diff}"

    print("KERNEL_OK")
</pallas_src>

<mosaic_0001>
module attributes {stable_mosaic.version = 11 : i64} {
  func.func @_dsa_kernel(%arg0: i32, %arg1: i32, %arg2: memref<1x4x16x16xf32, #tpu.memory_space<vmem>>, %arg3: memref<98xf32, #tpu.memory_space<smem>>, %arg4: memref<1xf32, #tpu.memory_space<smem>>, %arg5: memref<1x16x128xf32, #tpu.memory_space<vmem>>, %arg6: memref<2x24x128xf32, #tpu.memory_space<vmem>>) attributes {dimension_semantics = [#tpu.dimension_semantics<parallel>, #tpu.dimension_semantics<arbitrary>], iteration_bounds = array<i64: 2, 1>, scalar_prefetch = 0 : i64, scratch_operands = 1 : i64, tpu.core_type = #tpu.core_type<tc>, window_params = [{transform_indices = @transform_0, window_bounds = array<i64: 1, 4, 16, 16>}, {transform_indices = @transform_1, window_bounds = array<i64: 98>}, {transform_indices = @transform_2, window_bounds = array<i64: 1>}, {transform_indices = @transform_3, window_bounds = array<i64: 1, 16, 128>}]} {
    %c0_i32 = arith.constant 0 : i32
    %0 = arith.cmpi eq, %arg1, %c0_i32 : i32
    %1 = arith.extui %0 : i1 to i32
    %c0_i32_0 = arith.constant 0 : i32
    %2 = arith.cmpi ne, %1, %c0_i32_0 : i32
    scf.if %2 {
      %cst_27 = arith.constant 0.000000e+00 : f32
      %40 = vector.broadcast %cst_27 : f32 to vector<16x128xf32>
      %c0_28 = arith.constant 0 : index
      %c0_29 = arith.constant 0 : index
      %c0_30 = arith.constant 0 : index
      %41 = vector.load %arg6[%c0_28, %c0_29, %c0_30] : memref<2x24x128xf32, #tpu.memory_space<vmem>>, vector<1x16x128xf32>
      %42 = vector.shape_cast %41 : vector<1x16x128xf32> to vector<16x128xf32>
      %43 = vector.shape_cast %40 : vector<16x128xf32> to vector<1x16x128xf32>
      tpu.vector_store %arg6[%c0_28, %c0_29, %c0_30], %43 {strides = array<i32>} : memref<2x24x128xf32, #tpu.memory_space<vmem>>, vector<1x16x128xf32>,
      %cst_31 = arith.constant 0xFF800000 : f32
      %44 = vector.broadcast %cst_31 : f32 to vector<16x128xf32>
      %c1_32 = arith.constant 1 : index
      %c0_33 = arith.constant 0 : index
      %c0_34 = arith.constant 0 : index
      %45 = vector.load %arg6[%c1_32, %c0_33, %c0_34] : memref<2x24x128xf32, #tpu.memory_space<vmem>>, vector<1x16x128xf32>
      %46 = vector.shape_cast %45 : vector<1x16x128xf32> to vector<16x128xf32>
      %47 = vector.shape_cast %44 : vector<16x128xf32> to vector<1x16x128xf32>
      tpu.vector_store %arg6[%c1_32, %c0_33, %c0_34], %47 {strides = array<i32>} : memref<2x24x128xf32, #tpu.memory_space<vmem>>, vector<1x16x128xf32>,
    } else {
    }
    %cst = arith.constant 0.000000e+00 : f32
    %3 = vector.broadcast %cst : f32 to vector<16x16xf32>
    %cst_1 = arith.constant 0xFF800000 : f32
    %4 = vector.broadcast %cst_1 : f32 to vector<16x16xf32>
    %c0_i32_2 = arith.constant 0 : i32
    %c0 = arith.constant 0 : index
    %5 = arith.index_cast %c0_i32_2 : i32 to index
    %c0_3 = arith.constant 0 : index
    %c0_4 = arith.constant 0 : index
    %6 = vector.load %arg2[%c0, %5, %c0_3, %c0_4] : memref<1x4x16x16xf32, #tpu.memory_space<vmem>>, vector<1x1x16x16xf32>
    %7 = vector.shape_cast %6 : vector<1x1x16x16xf32> to vector<16x16xf32>
    %8 = arith.addf %3, %7 : vector<16x16xf32>
    %9 = arith.maximumf %4, %7 : vector<16x16xf32>
    %c1_i32 = arith.constant 1 : i32
    %c0_5 = arith.constant 0 : index
    %10 = arith.index_cast %c1_i32 : i32 to index
    %c0_6 = arith.constant 0 : index
    %c0_7 = arith.constant 0 : index
    %11 = vector.load %arg2[%c0_5, %10, %c0_6, %c0_7] : memref<1x4x16x16xf32, #tpu.memory_space<vmem>>, vector<1x1x16x16xf32>
    %12 = vector.shape_cast %11 : vector<1x1x16x16xf32> to vector<16x16xf32>
    %13 = arith.addf %8, %12 : vector<16x16xf32>
    %14 = arith.maximumf %9, %12 : vector<16x16xf32>
    %c2_i32 = arith.constant 2 : i32
    %c0_8 = arith.constant 0 : index
    %15 = arith.index_cast %c2_i32 : i32 to index
    %c0_9 = arith.constant 0 : index
    %c0_10 = arith.constant 0 : index
    %16 = vector.load %arg2[%c0_8, %15, %c0_9, %c0_10] : memref<1x4x16x16xf32, #tpu.memory_space<vmem>>, vector<1x1x16x16xf32>
    %17 = vector.shape_cast %16 : vector<1x1x16x16xf32> to vector<16x16xf32>
    %18 = arith.addf %13, %17 : vector<16x16xf32>
    %19 = arith.maximumf %14, %17 : vector<16x16xf32>
    %c3_i32 = arith.constant 3 : i32
    %c0_11 = arith.constant 0 : index
    %20 = arith.index_cast %c3_i32 : i32 to index
    %c0_12 = arith.constant 0 : index
    %c0_13 = arith.constant 0 : index
    %21 = vector.load %arg2[%c0_11, %20, %c0_12, %c0_13] : memref<1x4x16x16xf32, #tpu.memory_space<vmem>>, vector<1x1x16x16xf32>
    %22 = vector.shape_cast %21 : vector<1x1x16x16xf32> to vector<16x16xf32>
    %23 = arith.addf %18, %22 : vector<16x16xf32>
    %24 = arith.maximumf %19, %22 : vector<16x16xf32>
    %c4_i32 = arith.constant 4 : i32
    %c0_14 = arith.constant 0 : index
    %c0_15 = arith.constant 0 : index
    %c0_16 = arith.constant 0 : index
    %25 = vector.load %arg6[%c0_14, %c0_15, %c0_16] : memref<2x24x128xf32, #tpu.memory_space<vmem>>, vector<1x16x16xf32>
    %26 = vector.shape_cast %25 : vector<1x16x16xf32> to vector<16x16xf32>
    %27 = arith.addf %26, %23 : vector<16x16xf32>
    %c0_17 = arith.constant 0 : index
    %c0_18 = arith.constant 0 : index
    %c0_19 = arith.constant 0 : index
    %28 = vector.load %arg6[%c0_17, %c0_18, %c0_19] : memref<2x24x128xf32, #tpu.memory_space<vmem>>, vector<1x16x16xf32>
    %29 = vector.shape_cast %28 : vector<1x16x16xf32> to vector<16x16xf32>
    %30 = vector.shape_cast %27 : vector<16x16xf32> to vector<1x16x16xf32>
    tpu.vector_store %arg6[%c0_17, %c0_18, %c0_19], %30 {strides = array<i32>} : memref<2x24x128xf32, #tpu.memory_space<vmem>>, vector<1x16x16xf32>,
    %c1 = arith.constant 1 : index
    %c0_20 = arith.constant 0 : index
    %c0_21 = arith.constant 0 : index
    %31 = vector.load %arg6[%c1, %c0_20, %c0_21] : memref<2x24x128xf32, #tpu.memory_space<vmem>>, vector<1x16x16xf32>
    %32 = vector.shape_cast %31 : vector<1x16x16xf32> to vector<16x16xf32>
    %33 = arith.maximumf %32, %24 : vector<16x16xf32>
    %c1_22 = arith.constant 1 : index
    %c0_23 = arith.constant 0 : index
    %c0_24 = arith.constant 0 : index
    %34 = vector.load %arg6[%c1_22, %c0_23, %c0_24] : memref<2x24x128xf32, #tpu.memory_space<vmem>>, vector<1x16x16xf32>
    %35 = vector.shape_cast %34 : vector<1x16x16xf32> to vector<16x16xf32>
    %36 = vector.shape_cast %33 : vector<16x16xf32> to vector<1x16x16xf32>
    tpu.vector_store %arg6[%c1_22, %c0_23, %c0_24], %36 {strides = array<i32>} : memref<2x24x128xf32, #tpu.memory_space<vmem>>, vector<1x16x16xf32>,
    %c0_i32_25 = arith.constant 0 : i32
    %37 = arith.cmpi eq, %arg1, %c0_i32_25 : i32
    %38 = arith.extui %37 : i1 to i32
    %c0_i32_26 = arith.constant 0 : i32
    %39 = arith.cmpi ne, %38, %c0_i32_26 : i32
    scf.if %39 {
      %c0_27 = arith.constant 0 : index
      %c0_28 = arith.constant 0 : index
      %c0_29 = arith.constant 0 : index
      %40 = vector.load %arg6[%c0_27, %c0_28, %c0_29] : memref<2x24x128xf32, #tpu.memory_space<vmem>>, vector<1x16x128xf32>
      %41 = vector.shape_cast %40 : vector<1x16x128xf32> to vector<16x128xf32>
      %c1_30 = arith.constant 1 : index
      %c0_31 = arith.constant 0 : index
      %c0_32 = arith.constant 0 : index
      %42 = vector.load %arg6[%c1_30, %c0_31, %c0_32] : memref<2x24x128xf32, #tpu.memory_space<vmem>>, vector<1x16x128xf32>
      %43 = vector.shape_cast %42 : vector<1x16x128xf32> to vector<16x128xf32>
      %44 = tpu.iota {dimensions = array<i32: 0>} : vector<16x128xi32>
      %45 = tpu.iota {dimensions = array<i32: 1>} : vector<16x128xi32>
      %c16_i32 = arith.constant 16 : i32
      %46 = vector.broadcast %c16_i32 : i32 to vector<16x128xi32>
      %47 = arith.cmpi slt, %44, %46 : vector<16x128xi32>
      %c16_i32_33 = arith.constant 16 : i32
      %48 = vector.broadcast %c16_i32_33 : i32 to vector<16x128xi32>
      %49 = arith.cmpi slt, %45, %48 : vector<16x128xi32>
      %50 = arith.andi %47, %49 : vector<16x128xi1>
      %cst_34 = arith.constant 2.500000e-01 : f32
      %51 = vector.broadcast %cst_34 : f32 to vector<16x128xf32>
      %52 = arith.mulf %41, %51 : vector<16x128xf32>
      %cst_35 = arith.constant 0.000000e+00 : f32
      %53 = vector.broadcast %cst_35 : f32 to vector<16x128xf32>
      %54 = arith.select %50, %52, %53 : vector<16x128xi1>, vector<16x128xf32>
      %cst_36 = arith.constant 0.000000e+00 : f32
      %55 = vector.broadcast %cst_36 : f32 to vector<16x128xf32>
      %56 = arith.select %50, %43, %55 : vector<16x128xi1>, vector<16x128xf32>
      %cst_37 = arith.constant 0.000000e+00 : f32
      %57 = vector.broadcast %cst_37 : f32 to vector<8x128xf32>
      %58 = tpu.concatenate %54, %57 in 0 : vector<16x128xf32>, vector<8x128xf32> -> vector<24x128xf32>
      %c3_i32_38 = arith.constant 3 : i32
      %59 = tpu.dynamic_rotate %58 by %c3_i32_38 dim 0 : vector<24x128xf32>, i32 -> vector<24x128xf32>
      %c0_39 = arith.constant 0 : index
      %c0_40 = arith.constant 0 : index
      %c0_41 = arith.constant 0 : index
      %60 = vector.load %arg6[%c0_39, %c0_40, %c0_41] : memref<2x24x128xf32, #tpu.memory_space<vmem>>, vector<1x24x128xf32>
      %61 = vector.shape_cast %60 : vector<1x24x128xf32> to vector<24x128xf32>
      %62 = vector.shape_cast %59 : vector<24x128xf32> to vector<1x24x128xf32>
      tpu.vector_store %arg6[%c0_39, %c0_40, %c0_41], %62 {strides = array<i32>} : memref<2x24x128xf32, #tpu.memory_space<vmem>>, vector<1x24x128xf32>,
      %63 = tpu.concatenate %56, %57 in 0 : vector<16x128xf32>, vector<8x128xf32> -> vector<24x128xf32>
      %c3_i32_42 = arith.constant 3 : i32
      %64 = tpu.dynamic_rotate %63 by %c3_i32_42 dim 0 : vector<24x128xf32>, i32 -> vector<24x128xf32>
      %c1_43 = arith.constant 1 : index
      %c0_44 = arith.constant 0 : index
      %c0_45 = arith.constant 0 : index
      %65 = vector.load %arg6[%c1_43, %c0_44, %c0_45] : memref<2x24x128xf32, #tpu.memory_space<vmem>>, vector<1x24x128xf32>
      %66 = vector.shape_cast %65 : vector<1x24x128xf32> to vector<24x128xf32>
      %67 = vector.shape_cast %64 : vector<24x128xf32> to vector<1x24x128xf32>
      tpu.vector_store %arg6[%c1_43, %c0_44, %c0_45], %67 {strides = array<i32>} : memref<2x24x128xf32, #tpu.memory_space<vmem>>, vector<1x24x128xf32>,
      %c0_46 = arith.constant 0 : index
      %68 = memref.load %arg3[%c0_46] : memref<98xf32, #tpu.memory_space<smem>>
      %c1_47 = arith.constant 1 : index
      %69 = memref.load %arg3[%c1_47] : memref<98xf32, #tpu.memory_space<smem>>
      %c2 = arith.constant 2 : index
      %70 = memref.load %arg3[%c2] : memref<98xf32, #tpu.memory_space<smem>>
      %c3 = arith.constant 3 : index
      %71 = memref.load %arg3[%c3] : memref<98xf32, #tpu.memory_space<smem>>
      %c4 = arith.constant 4 : index
      %72 = memref.load %arg3[%c4] : memref<98xf32, #tpu.memory_space<smem>>
      %c5 = arith.constant 5 : index
      %73 = memref.load %arg3[%c5] : memref<98xf32, #tpu.memory_space<smem>>
      %c6 = arith.constant 6 : index
      %74 = memref.load %arg3[%c6] : memref<98xf32, #tpu.memory_space<smem>>
      %c7 = arith.constant 7 : index
      %75 = memref.load %arg3[%c7] : memref<98xf32, #tpu.memory_space<smem>>
      %c8 = arith.constant 8 : index
      %76 = memref.load %arg3[%c8] : memref<98xf32, #tpu.memory_space<smem>>
      %c9 = arith.constant 9 : index
      %77 = memref.load %arg3[%c9] : memref<98xf32, #tpu.memory_space<smem>>
      %c10 = arith.constant 10 : index
      %78 = memref.load %arg3[%c10] : memref<98xf32, #tpu.memory_space<smem>>
      %c11 = arith.constant 11 : index
      %79 = memref.load %arg3[%c11] : memref<98xf32, #tpu.memory_space<smem>>
      %c12 = arith.constant 12 : index
      %80 = memref.load %arg3[%c12] : memref<98xf32, #tpu.memory_space<smem>>
      %c13 = arith.constant 13 : index
      %81 = memref.load %arg3[%c13] : memref<98xf32, #tpu.memory_space<smem>>
      %c14 = arith.constant 14 : index
      %82 = memref.load %arg3[%c14] : memref<98xf32, #tpu.memory_space<smem>>
      %c15 = arith.constant 15 : index
      %83 = memref.load %arg3[%c15] : memref<98xf32, #tpu.memory_space<smem>>
      %c16 = arith.constant 16 : index
      %84 = memref.load %arg3[%c16] : memref<98xf32, #tpu.memory_space<smem>>
      %c17 = arith.constant 17 : index
      %85 = memref.load %arg3[%c17] : memref<98xf32, #tpu.memory_space<smem>>
      %c18 = arith.constant 18 : index
      %86 = memref.load %arg3[%c18] : memref<98xf32, #tpu.memory_space<smem>>
      %c19 = arith.constant 19 : index
      %87 = memref.load %arg3[%c19] : memref<98xf32, #tpu.memory_space<smem>>
      %c20 = arith.constant 20 : index
      %88 = memref.load %arg3[%c20] : memref<98xf32, #tpu.memory_space<smem>>
      %c21 = arith.constant 21 : index
      %89 = memref.load %arg3[%c21] : memref<98xf32, #tpu.memory_space<smem>>
      %c22 = arith.constant 22 : index
      %90 = memref.load %arg3[%c22] : memref<98xf32, #tpu.memory_space<smem>>
      %c23 = arith.constant 23 : index
      %91 = memref.load %arg3[%c23] : memref<98xf32, #tpu.memory_space<smem>>
      %c24 = arith.constant 24 : index
      %92 = memref.load %arg3[%c24] : memref<98xf32, #tpu.memory_space<smem>>
      %c25 = arith.constant 25 : index
      %93 = memref.load %arg3[%c25] : memref<98xf32, #tpu.memory_space<smem>>
      %c26 = arith.constant 26 : index
      %94 = memref.load %arg3[%c26] : memref<98xf32, #tpu.memory_space<smem>>
      %c27 = arith.constant 27 : index
      %95 = memref.load %arg3[%c27] : memref<98xf32, #tpu.memory_space<smem>>
      %c28 = arith.constant 28 : index
      %96 = memref.load %arg3[%c28] : memref<98xf32, #tpu.memory_space<smem>>
      %c29 = arith.constant 29 : index
      %97 = memref.load %arg3[%c29] : memref<98xf32, #tpu.memory_space<smem>>
      %c30 = arith.constant 30 : index
      %98 = memref.load %arg3[%c30] : memref<98xf32, #tpu.memory_space<smem>>
      %c31 = arith.constant 31 : index
      %99 = memref.load %arg3[%c31] : memref<98xf32, #tpu.memory_space<smem>>
      %c32 = arith.constant 32 : index
      %100 = memref.load %arg3[%c32] : memref<98xf32, #tpu.memory_space<smem>>
      %c33 = arith.constant 33 : index
      %101 = memref.load %arg3[%c33] : memref<98xf32, #tpu.memory_space<smem>>
      %c34 = arith.constant 34 : index
      %102 = memref.load %arg3[%c34] : memref<98xf32, #tpu.memory_space<smem>>
      %c35 = arith.constant 35 : index
      %103 = memref.load %arg3[%c35] : memref<98xf32, #tpu.memory_space<smem>>
      %c36 = arith.constant 36 : index
      %104 = memref.load %arg3[%c36] : memref<98xf32, #tpu.memory_space<smem>>
      %c37 = arith.constant 37 : index
      %105 = memref.load %arg3[%c37] : memref<98xf32, #tpu.memory_space<smem>>
      %c38 = arith.constant 38 : index
      %106 = memref.load %arg3[%c38] : memref<98xf32, #tpu.memory_space<smem>>
      %c39 = arith.constant 39 : index
      %107 = memref.load %arg3[%c39] : memref<98xf32, #tpu.memory_space<smem>>
      %c40 = arith.constant 40 : index
      %108 = memref.load %arg3[%c40] : memref<98xf32, #tpu.memory_space<smem>>
      %c41 = arith.constant 41 : index
      %109 = memref.load %arg3[%c41] : memref<98xf32, #tpu.memory_space<smem>>
      %c42 = arith.constant 42 : index
      %110 = memref.load %arg3[%c42] : memref<98xf32, #tpu.memory_space<smem>>
      %c43 = arith.constant 43 : index
      %111 = memref.load %arg3[%c43] : memref<98xf32, #tpu.memory_space<smem>>
      %c44 = arith.constant 44 : index
      %112 = memref.load %arg3[%c44] : memref<98xf32, #tpu.memory_space<smem>>
      %c45 = arith.constant 45 : index
      %113 = memref.load %arg3[%c45] : memref<98xf32, #tpu.memory_space<smem>>
      %c46 = arith.constant 46 : index
      %114 = memref.load %arg3[%c46] : memref<98xf32, #tpu.memory_space<smem>>
      %c47 = arith.constant 47 : index
      %115 = memref.load %arg3[%c47] : memref<98xf32, #tpu.memory_space<smem>>
      %c48 = arith.constant 48 : index
      %116 = memref.load %arg3[%c48] : memref<98xf32, #tpu.memory_space<smem>>
      %c49 = arith.constant 49 : index
      %117 = memref.load %arg3[%c49] : memref<98xf32, #tpu.memory_space<smem>>
      %c50 = arith.constant 50 : index
      %118 = memref.load %arg3[%c50] : memref<98xf32, #tpu.memory_space<smem>>
      %c51 = arith.constant 51 : index
      %119 = memref.load %arg3[%c51] : memref<98xf32, #tpu.memory_space<smem>>
      %c52 = arith.constant 52 : index
      %120 = memref.load %arg3[%c52] : memref<98xf32, #tpu.memory_space<smem>>
      %c53 = arith.constant 53 : index
      %121 = memref.load %arg3[%c53] : memref<98xf32, #tpu.memory_space<smem>>
      %c54 = arith.constant 54 : index
      %122 = memref.load %arg3[%c54] : memref<98xf32, #tpu.memory_space<smem>>
      %c55 = arith.constant 55 : index
      %123 = memref.load %arg3[%c55] : memref<98xf32, #tpu.memory_space<smem>>
      %c56 = arith.constant 56 : index
      %124 = memref.load %arg3[%c56] : memref<98xf32, #tpu.memory_space<smem>>
      %c57 = arith.constant 57 : index
      %125 = memref.load %arg3[%c57] : memref<98xf32, #tpu.memory_space<smem>>
      %c58 = arith.constant 58 : index
      %126 = memref.load %arg3[%c58] : memref<98xf32, #tpu.memory_space<smem>>
      %c59 = arith.constant 59 : index
      %127 = memref.load %arg3[%c59] : memref<98xf32, #tpu.memory_space<smem>>
      %c60 = arith.constant 60 : index
      %128 = memref.load %arg3[%c60] : memref<98xf32, #tpu.memory_space<smem>>
      %c61 = arith.constant 61 : index
      %129 = memref.load %arg3[%c61] : memref<98xf32, #tpu.memory_space<smem>>
      %c62 = arith.constant 62 : index
      %130 = memref.load %arg3[%c62] : memref<98xf32, #tpu.memory_space<smem>>
      %c63 = arith.constant 63 : index
      %131 = memref.load %arg3[%c63] : memref<98xf32, #tpu.memory_space<smem>>
      %c64 = arith.constant 64 : index
      %132 = memref.load %arg3[%c64] : memref<98xf32, #tpu.memory_space<smem>>
      %c65 = arith.constant 65 : index
      %133 = memref.load %arg3[%c65] : memref<98xf32, #tpu.memory_space<smem>>
      %c66 = arith.constant 66 : index
      %134 = memref.load %arg3[%c66] : memref<98xf32, #tpu.memory_space<smem>>
      %c67 = arith.constant 67 : index
      %135 = memref.load %arg3[%c67] : memref<98xf32, #tpu.memory_space<smem>>
      %c68 = arith.constant 68 : index
      %136 = memref.load %arg3[%c68] : memref<98xf32, #tpu.memory_space<smem>>
      %c69 = arith.constant 69 : index
      %137 = memref.load %arg3[%c69] : memref<98xf32, #tpu.memory_space<smem>>
      %c70 = arith.constant 70 : index
      %138 = memref.load %arg3[%c70] : memref<98xf32, #tpu.memory_space<smem>>
      %c71 = arith.constant 71 : index
      %139 = memref.load %arg3[%c71] : memref<98xf32, #tpu.memory_space<smem>>
      %c72 = arith.constant 72 : index
      %140 = memref.load %arg3[%c72] : memref<98xf32, #tpu.memory_space<smem>>
      %c73 = arith.constant 73 : index
      %141 = memref.load %arg3[%c73] : memref<98xf32, #tpu.memory_space<smem>>
      %c74 = arith.constant 74 : index
      %142 = memref.load %arg3[%c74] : memref<98xf32, #tpu.memory_space<smem>>
      %c75 = arith.constant 75 : index
      %143 = memref.load %arg3[%c75] : memref<98xf32, #tpu.memory_space<smem>>
      %c76 = arith.constant 76 : index
      %144 = memref.load %arg3[%c76] : memref<98xf32, #tpu.memory_space<smem>>
      %c77 = arith.constant 77 : index
      %145 = memref.load %arg3[%c77] : memref<98xf32, #tpu.memory_space<smem>>
      %c78 = arith.constant 78 : index
      %146 = memref.load %arg3[%c78] : memref<98xf32, #tpu.memory_space<smem>>
      %c79 = arith.constant 79 : index
      %147 = memref.load %arg3[%c79] : memref<98xf32, #tpu.memory_space<smem>>
      %c80 = arith.constant 80 : index
      %148 = memref.load %arg3[%c80] : memref<98xf32, #tpu.memory_space<smem>>
      %c81 = arith.constant 81 : index
      %149 = memref.load %arg3[%c81] : memref<98xf32, #tpu.memory_space<smem>>
      %c82 = arith.constant 82 : index
      %150 = memref.load %arg3[%c82] : memref<98xf32, #tpu.memory_space<smem>>
      %c83 = arith.constant 83 : index
      %151 = memref.load %arg3[%c83] : memref<98xf32, #tpu.memory_space<smem>>
      %c84 = arith.constant 84 : index
      %152 = memref.load %arg3[%c84] : memref<98xf32, #tpu.memory_space<smem>>
      %c85 = arith.constant 85 : index
      %153 = memref.load %arg3[%c85] : memref<98xf32, #tpu.memory_space<smem>>
      %c86 = arith.constant 86 : index
      %154 = memref.load %arg3[%c86] : memref<98xf32, #tpu.memory_space<smem>>
      %c87 = arith.constant 87 : index
      %155 = memref.load %arg3[%c87] : memref<98xf32, #tpu.memory_space<smem>>
      %c88 = arith.constant 88 : index
      %156 = memref.load %arg3[%c88] : memref<98xf32, #tpu.memory_space<smem>>
      %c89 = arith.constant 89 : index
      %157 = memref.load %arg3[%c89] : memref<98xf32, #tpu.memory_space<smem>>
      %c90 = arith.constant 90 : index
      %158 = memref.load %arg3[%c90] : memref<98xf32, #tpu.memory_space<smem>>
      %c91 = arith.constant 91 : index
      %159 = memref.load %arg3[%c91] : memref<98xf32, #tpu.memory_space<smem>>
      %c92 = arith.constant 92 : index
      %160 = memref.load %arg3[%c92] : memref<98xf32, #tpu.memory_space<smem>>
      %c93 = arith.constant 93 : index
      %161 = memref.load %arg3[%c93] : memref<98xf32, #tpu.memory_space<smem>>
      %c94 = arith.constant 94 : index
      %162 = memref.load %arg3[%c94] : memref<98xf32, #tpu.memory_space<smem>>
      %c95 = arith.constant 95 : index
      %163 = memref.load %arg3[%c95] : memref<98xf32, #tpu.memory_space<smem>>
      %c96 = arith.constant 96 : index
      %164 = memref.load %arg3[%c96] : memref<98xf32, #tpu.memory_space<smem>>
      %c97 = arith.constant 97 : index
      %165 = memref.load %arg3[%c97] : memref<98xf32, #tpu.memory_space<smem>>
      %c0_48 = arith.constant 0 : index
      %166 = memref.load %arg4[%c0_48] : memref<1xf32, #tpu.memory_space<smem>>
      %c0_i32_49 = arith.constant 0 : i32
      %c16_i32_50 = arith.constant 16 : i32
      %167 = arith.muli %c0_i32_49, %c16_i32_50 : i32
      %168 = tpu.assume_multiple %167, 8 : i32
      %cst_51 = arith.constant 0.000000e+00 : f32
      %169 = vector.broadcast %cst_51 : f32 to vector<24x128xf32>
      %cst_52 = arith.constant 0.000000e+00 : f32
      %170 = vector.broadcast %cst_52 : f32 to vector<24x128xf32>
      %cst_53 = arith.constant 0.000000e+00 : f32
      %171 = vector.broadcast %cst_53 : f32 to vector<24x128xf32>
      %cst_54 = arith.constant 0.000000e+00 : f32
      %172 = vector.broadcast %cst_54 : f32 to vector<24x128xf32>
      %cst_55 = arith.constant 0.000000e+00 : f32
      %173 = vector.broadcast %cst_55 : f32 to vector<24x128xf32>
      %cst_56 = arith.constant 0.000000e+00 : f32
      %174 = vector.broadcast %cst_56 : f32 to vector<24x128xf32>
      %cst_57 = arith.constant 0.000000e+00 : f32
      %175 = vector.broadcast %cst_57 : f32 to vector<24x128xf32>
      %c0_58 = arith.constant 0 : index
      %176 = arith.index_cast %168 : i32 to index
      %c0_59 = arith.constant 0 : index
      %177 = vector.load %arg6[%c0_58, %176, %c0_59] : memref<2x24x128xf32, #tpu.memory_space<vmem>>, vector<1x24x128xf32>
      %178 = vector.shape_cast %177 : vector<1x24x128xf32> to vector<24x128xf32>
      %c3_i32_60 = arith.constant 3 : i32
      %179 = tpu.dynamic_rotate %178 by %c3_i32_60 dim 1 : vector<24x128xf32>, i32 -> vector<24x128xf32>
      %180 = vector.broadcast %68 : f32 to vector<24x128xf32>
      %181 = arith.mulf %180, %179 : vector<24x128xf32>
      %182 = arith.addf %169, %181 : vector<24x128xf32>
      %183 = vector.broadcast %75 : f32 to vector<24x128xf32>
      %184 = arith.mulf %183, %179 : vector<24x128xf32>
      %185 = arith.addf %170, %184 : vector<24x128xf32>
      %186 = vector.broadcast %82 : f32 to vector<24x128xf32>
      %187 = arith.mulf %186, %179 : vector<24x128xf32>
      %188 = arith.addf %171, %187 : vector<24x128xf32>
      %189 = vector.broadcast %89 : f32 to vector<24x128xf32>
      %190 = arith.mulf %189, %179 : vector<24x128xf32>
      %191 = arith.addf %172, %190 : vector<24x128xf32>
      %192 = vector.broadcast %96 : f32 to vector<24x128xf32>
      %193 = arith.mulf %192, %179 : vector<24x128xf32>
      %194 = arith.addf %173, %193 : vector<24x128xf32>
      %195 = vector.broadcast %103 : f32 to vector<24x128xf32>
      %196 = arith.mulf %195, %179 : vector<24x128xf32>
      %197 = arith.addf %174, %196 : vector<24x128xf32>
      %198 = vector.broadcast %110 : f32 to vector<24x128xf32>
      %199 = arith.mulf %198, %179 : vector<24x128xf32>
      %200 = arith.addf %175, %199 : vector<24x128xf32>
      %c2_i32_61 = arith.constant 2 : i32
      %201 = tpu.dynamic_rotate %178 by %c2_i32_61 dim 1 : vector<24x128xf32>, i32 -> vector<24x128xf32>
      %202 = vector.broadcast %69 : f32 to vector<24x128xf32>
      %203 = arith.mulf %202, %201 : vector<24x128xf32>
      %204 = arith.addf %182, %203 : vector<24x128xf32>
      %205 = vector.broadcast %76 : f32 to vector<24x128xf32>
      %206 = arith.mulf %205, %201 : vector<24x128xf32>
      %207 = arith.addf %185, %206 : vector<24x128xf32>
      %208 = vector.broadcast %83 : f32 to vector<24x128xf32>
      %209 = arith.mulf %208, %201 : vector<24x128xf32>
      %210 = arith.addf %188, %209 : vector<24x128xf32>
      %211 = vector.broadcast %90 : f32 to vector<24x128xf32>
      %212 = arith.mulf %211, %201 : vector<24x128xf32>
      %213 = arith.addf %191, %212 : vector<24x128xf32>
      %214 = vector.broadcast %97 : f32 to vector<24x128xf32>
      %215 = arith.mulf %214, %201 : vector<24x128xf32>
      %216 = arith.addf %194, %215 : vector<24x128xf32>
      %217 = vector.broadcast %104 : f32 to vector<24x128xf32>
      %218 = arith.mulf %217, %201 : vector<24x128xf32>
      %219 = arith.addf %197, %218 : vector<24x128xf32>
      %220 = vector.broadcast %111 : f32 to vector<24x128xf32>
      %221 = arith.mulf %220, %201 : vector<24x128xf32>
      %222 = arith.addf %200, %221 : vector<24x128xf32>
      %c1_i32_62 = arith.constant 1 : i32
      %223 = tpu.dynamic_rotate %178 by %c1_i32_62 dim 1 : vector<24x128xf32>, i32 -> vector<24x128xf32>
      %224 = vector.broadcast %70 : f32 to vector<24x128xf32>
      %225 = arith.mulf %224, %223 : vector<24x128xf32>
      %226 = arith.addf %204, %225 : vector<24x128xf32>
      %227 = vector.broadcast %77 : f32 to vector<24x128xf32>
      %228 = arith.mulf %227, %223 : vector<24x128xf32>
      %229 = arith.addf %207, %228 : vector<24x128xf32>
      %230 = vector.broadcast %84 : f32 to vector<24x128xf32>
      %231 = arith.mulf %230, %223 : vector<24x128xf32>
      %232 = arith.addf %210, %231 : vector<24x128xf32>
      %233 = vector.broadcast %91 : f32 to vector<24x128xf32>
      %234 = arith.mulf %233, %223 : vector<24x128xf32>
      %235 = arith.addf %213, %234 : vector<24x128xf32>
      %236 = vector.broadcast %98 : f32 to vector<24x128xf32>
      %237 = arith.mulf %236, %223 : vector<24x128xf32>
      %238 = arith.addf %216, %237 : vector<24x128xf32>
      %239 = vector.broadcast %105 : f32 to vector<24x128xf32>
      %240 = arith.mulf %239, %223 : vector<24x128xf32>
      %241 = arith.addf %219, %240 : vector<24x128xf32>
      %242 = vector.broadcast %112 : f32 to vector<24x128xf32>
      %243 = arith.mulf %242, %223 : vector<24x128xf32>
      %244 = arith.addf %222, %243 : vector<24x128xf32>
      %245 = vector.broadcast %71 : f32 to vector<24x128xf32>
      %246 = arith.mulf %245, %178 : vector<24x128xf32>
      %247 = arith.addf %226, %246 : vector<24x128xf32>
      %248 = vector.broadcast %78 : f32 to vector<24x128xf32>
      %249 = arith.mulf %248, %178 : vector<24x128xf32>
      %250 = arith.addf %229, %249 : vector<24x128xf32>
      %251 = vector.broadcast %85 : f32 to vector<24x128xf32>
      %252 = arith.mulf %251, %178 : vector<24x128xf32>
      %253 = arith.addf %232, %252 : vector<24x128xf32>
      %254 = vector.broadcast %92 : f32 to vector<24x128xf32>
      %255 = arith.mulf %254, %178 : vector<24x128xf32>
      %256 = arith.addf %235, %255 : vector<24x128xf32>
      %257 = vector.broadcast %99 : f32 to vector<24x128xf32>
      %258 = arith.mulf %257, %178 : vector<24x128xf32>
      %259 = arith.addf %238, %258 : vector<24x128xf32>
      %260 = vector.broadcast %106 : f32 to vector<24x128xf32>
      %261 = arith.mulf %260, %178 : vector<24x128xf32>
      %262 = arith.addf %241, %261 : vector<24x128xf32>
      %263 = vector.broadcast %113 : f32 to vector<24x128xf32>
      %264 = arith.mulf %263, %178 : vector<24x128xf32>
      %265 = arith.addf %244, %264 : vector<24x128xf32>
      %c127_i32 = arith.constant 127 : i32
      %266 = tpu.dynamic_rotate %178 by %c127_i32 dim 1 : vector<24x128xf32>, i32 -> vector<24x128xf32>
      %267 = vector.broadcast %72 : f32 to vector<24x128xf32>
      %268 = arith.mulf %267, %266 : vector<24x128xf32>
      %269 = arith.addf %247, %268 : vector<24x128xf32>
      %270 = vector.broadcast %79 : f32 to vector<24x128xf32>
      %271 = arith.mulf %270, %266 : vector<24x128xf32>
      %272 = arith.addf %250, %271 : vector<24x128xf32>
      %273 = vector.broadcast %86 : f32 to vector<24x128xf32>
      %274 = arith.mulf %273, %266 : vector<24x128xf32>
      %275 = arith.addf %253, %274 : vector<24x128xf32>
      %276 = vector.broadcast %93 : f32 to vector<24x128xf32>
      %277 = arith.mulf %276, %266 : vector<24x128xf32>
      %278 = arith.addf %256, %277 : vector<24x128xf32>
      %279 = vector.broadcast %100 : f32 to vector<24x128xf32>
      %280 = arith.mulf %279, %266 : vector<24x128xf32>
      %281 = arith.addf %259, %280 : vector<24x128xf32>
      %282 = vector.broadcast %107 : f32 to vector<24x128xf32>
      %283 = arith.mulf %282, %266 : vector<24x128xf32>
      %284 = arith.addf %262, %283 : vector<24x128xf32>
      %285 = vector.broadcast %114 : f32 to vector<24x128xf32>
      %286 = arith.mulf %285, %266 : vector<24x128xf32>
      %287 = arith.addf %265, %286 : vector<24x128xf32>
      %c126_i32 = arith.constant 126 : i32
      %288 = tpu.dynamic_rotate %178 by %c126_i32 dim 1 : vector<24x128xf32>, i32 -> vector<24x128xf32>
      %289 = vector.broadcast %73 : f32 to vector<24x128xf32>
      %290 = arith.mulf %289, %288 : vector<24x128xf32>
      %291 = arith.addf %269, %290 : vector<24x128xf32>
      %292 = vector.broadcast %80 : f32 to vector<24x128xf32>
      %293 = arith.mulf %292, %288 : vector<24x128xf32>
      %294 = arith.addf %272, %293 : vector<24x128xf32>
      %295 = vector.broadcast %87 : f32 to vector<24x128xf32>
      %296 = arith.mulf %295, %288 : vector<24x128xf32>
      %297 = arith.addf %275, %296 : vector<24x128xf32>
      %298 = vector.broadcast %94 : f32 to vector<24x128xf32>
      %299 = arith.mulf %298, %288 : vector<24x128xf32>
      %300 = arith.addf %278, %299 : vector<24x128xf32>
      %301 = vector.broadcast %101 : f32 to vector<24x128xf32>
      %302 = arith.mulf %301, %288 : vector<24x128xf32>
      %303 = arith.addf %281, %302 : vector<24x128xf32>
      %304 = vector.broadcast %108 : f32 to vector<24x128xf32>
      %305 = arith.mulf %304, %288 : vector<24x128xf32>
      %306 = arith.addf %284, %305 : vector<24x128xf32>
      %307 = vector.broadcast %115 : f32 to vector<24x128xf32>
      %308 = arith.mulf %307, %288 : vector<24x128xf32>
      %309 = arith.addf %287, %308 : vector<24x128xf32>
      %c125_i32 = arith.constant 125 : i32
      %310 = tpu.dynamic_rotate %178 by %c125_i32 dim 1 : vector<24x128xf32>, i32 -> vector<24x128xf32>
      %311 = vector.broadcast %74 : f32 to vector<24x128xf32>
      %312 = arith.mulf %311, %310 : vector<24x128xf32>
      %313 = arith.addf %291, %312 : vector<24x128xf32>
      %314 = vector.broadcast %81 : f32 to vector<24x128xf32>
      %315 = arith.mulf %314, %310 : vector<24x128xf32>
      %316 = arith.addf %294, %315 : vector<24x128xf32>
      %317 = vector.broadcast %88 : f32 to vector<24x128xf32>
      %318 = arith.mulf %317, %310 : vector<24x128xf32>
      %319 = arith.addf %297, %318 : vector<24x128xf32>
      %320 = vector.broadcast %95 : f32 to vector<24x128xf32>
      %321 = arith.mulf %320, %310 : vector<24x128xf32>
      %322 = arith.addf %300, %321 : vector<24x128xf32>
      %323 = vector.broadcast %102 : f32 to vector<24x128xf32>
      %324 = arith.mulf %323, %310 : vector<24x128xf32>
      %325 = arith.addf %303, %324 : vector<24x128xf32>
      %326 = vector.broadcast %109 : f32 to vector<24x128xf32>
      %327 = arith.mulf %326, %310 : vector<24x128xf32>
      %328 = arith.addf %306, %327 : vector<24x128xf32>
      %329 = vector.broadcast %116 : f32 to vector<24x128xf32>
      %330 = arith.mulf %329, %310 : vector<24x128xf32>
      %331 = arith.addf %309, %330 : vector<24x128xf32>
      %c1_63 = arith.constant 1 : index
      %332 = arith.index_cast %168 : i32 to index
      %c0_64 = arith.constant 0 : index
      %333 = vector.load %arg6[%c1_63, %332, %c0_64] : memref<2x24x128xf32, #tpu.memory_space<vmem>>, vector<1x24x128xf32>
      %334 = vector.shape_cast %333 : vector<1x24x128xf32> to vector<24x128xf32>
      %c3_i32_65 = arith.constant 3 : i32
      %335 = tpu.dynamic_rotate %334 by %c3_i32_65 dim 1 : vector<24x128xf32>, i32 -> vector<24x128xf32>
      %336 = vector.broadcast %117 : f32 to vector<24x128xf32>
      %337 = arith.mulf %336, %335 : vector<24x128xf32>
      %338 = arith.addf %313, %337 : vector<24x128xf32>
      %339 = vector.broadcast %124 : f32 to vector<24x128xf32>
      %340 = arith.mulf %339, %335 : vector<24x128xf32>
      %341 = arith.addf %316, %340 : vector<24x128xf32>
      %342 = vector.broadcast %131 : f32 to vector<24x128xf32>
      %343 = arith.mulf %342, %335 : vector<24x128xf32>
      %344 = arith.addf %319, %343 : vector<24x128xf32>
      %345 = vector.broadcast %138 : f32 to vector<24x128xf32>
      %346 = arith.mulf %345, %335 : vector<24x128xf32>
      %347 = arith.addf %322, %346 : vector<24x128xf32>
      %348 = vector.broadcast %145 : f32 to vector<24x128xf32>
      %349 = arith.mulf %348, %335 : vector<24x128xf32>
      %350 = arith.addf %325, %349 : vector<24x128xf32>
      %351 = vector.broadcast %152 : f32 to vector<24x128xf32>
      %352 = arith.mulf %351, %335 : vector<24x128xf32>
      %353 = arith.addf %328, %352 : vector<24x128xf32>
      %354 = vector.broadcast %159 : f32 to vector<24x128xf32>
      %355 = arith.mulf %354, %335 : vector<24x128xf32>
      %356 = arith.addf %331, %355 : vector<24x128xf32>
      %c2_i32_66 = arith.constant 2 : i32
      %357 = tpu.dynamic_rotate %334 by %c2_i32_66 dim 1 : vector<24x128xf32>, i32 -> vector<24x128xf32>
      %358 = vector.broadcast %118 : f32 to vector<24x128xf32>
      %359 = arith.mulf %358, %357 : vector<24x128xf32>
      %360 = arith.addf %338, %359 : vector<24x128xf32>
      %361 = vector.broadcast %125 : f32 to vector<24x128xf32>
      %362 = arith.mulf %361, %357 : vector<24x128xf32>
      %363 = arith.addf %341, %362 : vector<24x128xf32>
      %364 = vector.broadcast %132 : f32 to vector<24x128xf32>
      %365 = arith.mulf %364, %357 : vector<24x128xf32>
      %366 = arith.addf %344, %365 : vector<24x128xf32>
      %367 = vector.broadcast %139 : f32 to vector<24x128xf32>
      %368 = arith.mulf %367, %357 : vector<24x128xf32>
      %369 = arith.addf %347, %368 : vector<24x128xf32>
      %370 = vector.broadcast %146 : f32 to vector<24x128xf32>
      %371 = arith.mulf %370, %357 : vector<24x128xf32>
      %372 = arith.addf %350, %371 : vector<24x128xf32>
      %373 = vector.broadcast %153 : f32 to vector<24x128xf32>
      %374 = arith.mulf %373, %357 : vector<24x128xf32>
      %375 = arith.addf %353, %374 : vector<24x128xf32>
      %376 = vector.broadcast %160 : f32 to vector<24x128xf32>
      %377 = arith.mulf %376, %357 : vector<24x128xf32>
      %378 = arith.addf %356, %377 : vector<24x128xf32>
      %c1_i32_67 = arith.constant 1 : i32
      %379 = tpu.dynamic_rotate %334 by %c1_i32_67 dim 1 : vector<24x128xf32>, i32 -> vector<24x128xf32>
      %380 = vector.broadcast %119 : f32 to vector<24x128xf32>
      %381 = arith.mulf %380, %379 : vector<24x128xf32>
      %382 = arith.addf %360, %381 : vector<24x128xf32>
      %383 = vector.broadcast %126 : f32 to vector<24x128xf32>
      %384 = arith.mulf %383, %379 : vector<24x128xf32>
      %385 = arith.addf %363, %384 : vector<24x128xf32>
      %386 = vector.broadcast %133 : f32 to vector<24x128xf32>
      %387 = arith.mulf %386, %379 : vector<24x128xf32>
      %388 = arith.addf %366, %387 : vector<24x128xf32>
      %389 = vector.broadcast %140 : f32 to vector<24x128xf32>
      %390 = arith.mulf %389, %379 : vector<24x128xf32>
      %391 = arith.addf %369, %390 : vector<24x128xf32>
      %392 = vector.broadcast %147 : f32 to vector<24x128xf32>
      %393 = arith.mulf %392, %379 : vector<24x128xf32>
      %394 = arith.addf %372, %393 : vector<24x128xf32>
      %395 = vector.broadcast %154 : f32 to vector<24x128xf32>
      %396 = arith.mulf %395, %379 : vector<24x128xf32>
      %397 = arith.addf %375, %396 : vector<24x128xf32>
      %398 = vector.broadcast %161 : f32 to vector<24x128xf32>
      %399 = arith.mulf %398, %379 : vector<24x128xf32>
      %400 = arith.addf %378, %399 : vector<24x128xf32>
      %401 = vector.broadcast %120 : f32 to vector<24x128xf32>
      %402 = arith.mulf %401, %334 : vector<24x128xf32>
      %403 = arith.addf %382, %402 : vector<24x128xf32>
      %404 = vector.broadcast %127 : f32 to vector<24x128xf32>
      %405 = arith.mulf %404, %334 : vector<24x128xf32>
      %406 = arith.addf %385, %405 : vector<24x128xf32>
      %407 = vector.broadcast %134 : f32 to vector<24x128xf32>
      %408 = arith.mulf %407, %334 : vector<24x128xf32>
      %409 = arith.addf %388, %408 : vector<24x128xf32>
      %410 = vector.broadcast %141 : f32 to vector<24x128xf32>
      %411 = arith.mulf %410, %334 : vector<24x128xf32>
      %412 = arith.addf %391, %411 : vector<24x128xf32>
      %413 = vector.broadcast %148 : f32 to vector<24x128xf32>
      %414 = arith.mulf %413, %334 : vector<24x128xf32>
      %415 = arith.addf %394, %414 : vector<24x128xf32>
      %416 = vector.broadcast %155 : f32 to vector<24x128xf32>
      %417 = arith.mulf %416, %334 : vector<24x128xf32>
      %418 = arith.addf %397, %417 : vector<24x128xf32>
      %419 = vector.broadcast %162 : f32 to vector<24x128xf32>
      %420 = arith.mulf %419, %334 : vector<24x128xf32>
      %421 = arith.addf %400, %420 : vector<24x128xf32>
      %c127_i32_68 = arith.constant 127 : i32
      %422 = tpu.dynamic_rotate %334 by %c127_i32_68 dim 1 : vector<24x128xf32>, i32 -> vector<24x128xf32>
      %423 = vector.broadcast %121 : f32 to vector<24x128xf32>
      %424 = arith.mulf %423, %422 : vector<24x128xf32>
      %425 = arith.addf %403, %424 : vector<24x128xf32>
      %426 = vector.broadcast %128 : f32 to vector<24x128xf32>
      %427 = arith.mulf %426, %422 : vector<24x128xf32>
      %428 = arith.addf %406, %427 : vector<24x128xf32>
      %429 = vector.broadcast %135 : f32 to vector<24x128xf32>
      %430 = arith.mulf %429, %422 : vector<24x128xf32>
      %431 = arith.addf %409, %430 : vector<24x128xf32>
      %432 = vector.broadcast %142 : f32 to vector<24x128xf32>
      %433 = arith.mulf %432, %422 : vector<24x128xf32>
      %434 = arith.addf %412, %433 : vector<24x128xf32>
      %435 = vector.broadcast %149 : f32 to vector<24x128xf32>
      %436 = arith.mulf %435, %422 : vector<24x128xf32>
      %437 = arith.addf %415, %436 : vector<24x128xf32>
      %438 = vector.broadcast %156 : f32 to vector<24x128xf32>
      %439 = arith.mulf %438, %422 : vector<24x128xf32>
      %440 = arith.addf %418, %439 : vector<24x128xf32>
      %441 = vector.broadcast %163 : f32 to vector<24x128xf32>
      %442 = arith.mulf %441, %422 : vector<24x128xf32>
      %443 = arith.addf %421, %442 : vector<24x128xf32>
      %c126_i32_69 = arith.constant 126 : i32
      %444 = tpu.dynamic_rotate %334 by %c126_i32_69 dim 1 : vector<24x128xf32>, i32 -> vector<24x128xf32>
      %445 = vector.broadcast %122 : f32 to vector<24x128xf32>
      %446 = arith.mulf %445, %444 : vector<24x128xf32>
      %447 = arith.addf %425, %446 : vector<24x128xf32>
      %448 = vector.broadcast %129 : f32 to vector<24x128xf32>
      %449 = arith.mulf %448, %444 : vector<24x128xf32>
      %450 = arith.addf %428, %449 : vector<24x128xf32>
      %451 = vector.broadcast %136 : f32 to vector<24x128xf32>
      %452 = arith.mulf %451, %444 : vector<24x128xf32>
      %453 = arith.addf %431, %452 : vector<24x128xf32>
      %454 = vector.broadcast %143 : f32 to vector<24x128xf32>
      %455 = arith.mulf %454, %444 : vector<24x128xf32>
      %456 = arith.addf %434, %455 : vector<24x128xf32>
      %457 = vector.broadcast %150 : f32 to vector<24x128xf32>
      %458 = arith.mulf %457, %444 : vector<24x128xf32>
      %459 = arith.addf %437, %458 : vector<24x128xf32>
      %460 = vector.broadcast %157 : f32 to vector<24x128xf32>
      %461 = arith.mulf %460, %444 : vector<24x128xf32>
      %462 = arith.addf %440, %461 : vector<24x128xf32>
      %463 = vector.broadcast %164 : f32 to vector<24x128xf32>
      %464 = arith.mulf %463, %444 : vector<24x128xf32>
      %465 = arith.addf %443, %464 : vector<24x128xf32>
      %c125_i32_70 = arith.constant 125 : i32
      %466 = tpu.dynamic_rotate %334 by %c125_i32_70 dim 1 : vector<24x128xf32>, i32 -> vector<24x128xf32>
      %467 = vector.broadcast %123 : f32 to vector<24x128xf32>
      %468 = arith.mulf %467, %466 : vector<24x128xf32>
      %469 = arith.addf %447, %468 : vector<24x128xf32>
      %470 = vector.broadcast %130 : f32 to vector<24x128xf32>
      %471 = arith.mulf %470, %466 : vector<24x128xf32>
      %472 = arith.addf %450, %471 : vector<24x128xf32>
      %473 = vector.broadcast %137 : f32 to vector<24x128xf32>
      %474 = arith.mulf %473, %466 : vector<24x128xf32>
      %475 = arith.addf %453, %474 : vector<24x128xf32>
      %476 = vector.broadcast %144 : f32 to vector<24x128xf32>
      %477 = arith.mulf %476, %466 : vector<24x128xf32>
      %478 = arith.addf %456, %477 : vector<24x128xf32>
      %479 = vector.broadcast %151 : f32 to vector<24x128xf32>
      %480 = arith.mulf %479, %466 : vector<24x128xf32>
      %481 = arith.addf %459, %480 : vector<24x128xf32>
      %482 = vector.broadcast %158 : f32 to vector<24x128xf32>
      %483 = arith.mulf %482, %466 : vector<24x128xf32>
      %484 = arith.addf %462, %483 : vector<24x128xf32>
      %485 = vector.broadcast %165 : f32 to vector<24x128xf32>
      %486 = arith.mulf %485, %466 : vector<24x128xf32>
      %487 = arith.addf %465, %486 : vector<24x128xf32>
      %c23_i32 = arith.constant 23 : i32
      %488 = tpu.dynamic_rotate %472 by %c23_i32 dim 0 : vector<24x128xf32>, i32 -> vector<24x128xf32>
      %489 = arith.addf %469, %488 : vector<24x128xf32>
      %c22_i32 = arith.constant 22 : i32
      %490 = tpu.dynamic_rotate %475 by %c22_i32 dim 0 : vector<24x128xf32>, i32 -> vector<24x128xf32>
      %491 = arith.addf %489, %490 : vector<24x128xf32>
      %c21_i32 = arith.constant 21 : i32
      %492 = tpu.dynamic_rotate %478 by %c21_i32 dim 0 : vector<24x128xf32>, i32 -> vector<24x128xf32>
      %493 = arith.addf %491, %492 : vector<24x128xf32>
      %c20_i32 = arith.constant 20 : i32
      %494 = tpu.dynamic_rotate %481 by %c20_i32 dim 0 : vector<24x128xf32>, i32 -> vector<24x128xf32>
      %495 = arith.addf %493, %494 : vector<24x128xf32>
      %c19_i32 = arith.constant 19 : i32
      %496 = tpu.dynamic_rotate %484 by %c19_i32 dim 0 : vector<24x128xf32>, i32 -> vector<24x128xf32>
      %497 = arith.addf %495, %496 : vector<24x128xf32>
      %c18_i32 = arith.constant 18 : i32
      %498 = tpu.dynamic_rotate %487 by %c18_i32 dim 0 : vector<24x128xf32>, i32 -> vector<24x128xf32>
      %499 = arith.addf %497, %498 : vector<24x128xf32>
      %500 = vector.extract_strided_slice %499 {offsets = [0, 0], sizes = [16, 128], strides = [1, 1]} : vector<24x128xf32> to vector<16x128xf32>
      %501 = vector.broadcast %166 : f32 to vector<16x128xf32>
      %502 = arith.addf %500, %501 : vector<16x128xf32>
      %503 = arith.negf %502 : vector<16x128xf32>
      %504 = math.exp %503 : vector<16x128xf32>
      %cst_71 = arith.constant 1.000000e+00 : f32
      %505 = vector.broadcast %cst_71 : f32 to vector<16x128xf32>
      %506 = arith.addf %505, %504 : vector<16x128xf32>
      %507 = arith.divf %505, %506 : vector<16x128xf32>
      %c0_72 = arith.constant 0 : index
      %508 = arith.index_cast %168 : i32 to index
      %c0_73 = arith.constant 0 : index
      %509 = vector.load %arg5[%c0_72, %508, %c0_73] : memref<1x16x128xf32, #tpu.memory_space<vmem>>, vector<1x16x128xf32>
      %510 = vector.shape_cast %509 : vector<1x16x128xf32> to vector<16x128xf32>
      %511 = vector.shape_cast %507 : vector<16x128xf32> to vector<1x16x128xf32>
      tpu.vector_store %arg5[%c0_72, %508, %c0_73], %511 {strides = array<i32>} : memref<1x16x128xf32, #tpu.memory_space<vmem>>, vector<1x16x128xf32>,
      %c1_i32_74 = arith.constant 1 : i32
    } else {
    }
    return
  }
  func.func @transform_0(%arg0: i32, %arg1: i32) -> (i32, i32, i32, i32) {
    %c0_i32 = arith.constant 0 : i32
    %c0_i32_0 = arith.constant 0 : i32
    %c0_i32_1 = arith.constant 0 : i32
    return %arg0, %arg1, %c0_i32, %c0_i32_0 : i32, i32, i32, i32
  }
  func.func @transform_1(%arg0: i32, %arg1: i32) -> i32 {
    %c0_i32 = arith.constant 0 : i32
    %c0_i32_0 = arith.constant 0 : i32
    return %c0_i32 : i32
  }
  func.func @transform_2(%arg0: i32, %arg1: i32) -> i32 {
    %c0_i32 = arith.constant 0 : i32
    %c0_i32_0 = arith.constant 0 : i32
    return %c0_i32 : i32
  }
  func.func @transform_3(%arg0: i32, %arg1: i32) -> (i32, i32, i32) {
    %c0_i32 = arith.constant 0 : i32
    %c0_i32_0 = arith.constant 0 : i32
    %c0_i32_1 = arith.constant 0 : i32
    return %arg0, %c0_i32, %c0_i32_0 : i32, i32, i32
  }
}

</mosaic_0001>

<bundles_post_ra>
// kernel: tpu_custom_call.1
= control target key start
LH: loop header
LB: loop body
LE: loop exit
PB: predicated region body
PF: predicated region fallthrough
CT: control target
= control target key end

     0   :  { %s3064_s0 = inlined_call_operand.hbm [shape: f32[2,4,16,16], index: 0, kind: input, shape index: {}]   ;;  %s3065_s1 = inlined_call_operand.vmem [shape: f32[98], index: 1, kind: input, shape index: {}]   ;;  %s3066_s2 = inlined_call_operand.<no memory space> [shape: f32[1], index: 2, kind: input, shape index: {}]   ;;  %s3067_s3 = inlined_call_operand.hbm [shape: f32[2,16,128], index: 3, kind: output, shape index: {}]  }
   0x1   :  { %3144 = sst [smem:[#allocation130_spill]] %s3064_s0 }
   0x2   :  { %3145 = sst [smem:[#allocation131_spill]] %s3065_s1 }
   0x3   :  { %3146 = sst [smem:[#allocation132_spill]] %s3067_s3 }
   0x4   :  { %8 = sst [smem:[#allocation3]] %s3066_s2 }
   0x5   :  { %9 = vsyncpa [#allocation5], 0 }
   0x6   :  { %11 = vsyncpa [#allocation5 + $0x1], 0 }
   0x7   :  { %12 = vsyncpa [#allocation7], 0 }
   0x8   :  { %13 = vsyncpa [#allocation6], 0 }
   0x9   :  { %15 = vsyncpa [#allocation6 + $0x1], 0  ;;  %s1710_s14 = smov 0   ;;  %s1712_s15 = smov 0  }
   0xa   :  { %s1714_s16 = smov 0   ;;  %s1716_s17 = smov 0  }
   0xb   :  { %s1718_s18 = smov 0   ;;  %s1720_s19 = smov 0  }
   0xc LB: > { %3147 = sst [smem:[#allocation13_spill]] %s1650_s14  ;;  %s1322_s2 = sadd.s32 4294967295, %s1670_s19   ;;  %s1670_s19 = sphi %s1720_s19, %s21_s19   ;;  %s1666_s18 = sphi %s1718_s18, %s3440_s18   ;;  %s1662_s17 = sphi %s1716_s17, %s3439_s17   ;;  %s1658_s16 = sphi %s1714_s16, %s3438_s16   ;;  %s1654_s15 = sphi %s1712_s15, %s3437_s15   ;;  %s1650_s14 = sphi %s1710_s14, %s3436_s14  }
   0xd   : > { %3148 = sst [smem:[#allocation14_spill]] %s1654_s15  ;;  %s1323_s20 = sadd.s32 4294967294, %s1670_s19  }
   0xe   : > { %3149 = sst [smem:[#allocation15_spill]] %s1658_s16  ;;  %s42_s21 = sadd.s32 1, %s1658_s16 }
   0xf   : > { %3150 = sst [smem:[#allocation16_spill]] %s1662_s17  ;;  %p49_p0 = scmp.ne.s32.totalorder %s1658_s16, %s1654_s15 }
  0x10   : > { %3151 = sst [smem:[#allocation17_spill]] %s1666_s18  ;;  %p50_p1 = scmp.eq.s32.totalorder %s1670_s19, 0 }
  0x11   : > { %3152 = sst [smem:[#allocation18_spill]] %s1670_s19  ;;  %p55_p2 = scmp.ne.s32.totalorder %s1654_s15, %s1650_s14 }
  0x12   : > { %p1748_p3 = scmp.eq.s32.totalorder %s1322_s2, 0  ;;  %p121_p4 = scmp.eq.s32.totalorder %s1322_s2, 1 }
  0x13   : > { %p1752_p5 = por %p50_p1, %p49_p0  ;;  %p127_p6 = scmp.eq.s32.totalorder %s1323_s20, 1 }
  0x14   : > { %s3153_s22 = scalar_select %p1748_p3, 1, 0 }
  0x15   : > { %p1758_p7 = por %p1748_p3, %p55_p2  ;;  %p1762_p8 = por %p121_p4, %p49_p0 }
  0x16   : > { %p1766_p9 = por %p127_p6, %p55_p2  ;;  %p1324_p10 = scmp.ge.s32.totalorder %s1670_s19, 1 }
  0x17   : > { %s3155_s24 = scalar_select %p1758_p7, 1, 0 }
  0x18   : > { %s3156_s25 = scalar_select %p1762_p8, 1, 0 }
  0x19   : > { %s3158_s26 = scalar_select %p1766_p9, 1, 0 }
  0x1a   : > { %3157 = sst [smem:[#allocation19_spill]] %s3156_s25  ;;  %p134_p11 = scmp.lt.s32.totalorder %s1670_s19, 3 }
  0x1b   : > { %3159 = sst [smem:[#allocation20_spill]] %s3158_s26  ;;  %s3160_s1 = sld [smem:[#allocation131_spill]] }
  0x1c   : > { %p1775_p12 = pnand %p1324_p10, %p134_p11  ;;  %p1467_p0 = scmp.lt.s32.totalorder %s1670_s19, 2 }
  0x1d   : > { %s33_s6 = sadd.s32 1, %s1666_s18  ;;  %s161_s8 = sand.u32 1, %s1658_s16  }
  0x1e   : > { %p1454_p1 = pneg %p1775_p12  ;;  %p1785_p2 = pnand %p1467_p0, %p1752_p5 }
  0x1f   : > { %p1796_p6 = scmp.ge.s32.totalorder %s33_s6, 2 }
  0x20   : > { %p1791_p4 = pnand %p1454_p1, %p1748_p3 }
  0x21   : > { %s147_s29 = sshll.u32 %s3160_s1, 4  ;;  %s148_s29 = int_to_ptr.vmem [resolvable:$true] %s147_s29 }
  0x22   : > { %s1539_s9 = scalar_lea.vmem %s148_s29, 16  ;;  %p1541_p11 = pneg %p1791_p4 }
  0x23   : > { %p1540_p10 = scmp.ne.s32.totalorder %s148_s29, %s1539_s9  ;;  %p1547_p13 = scmp.lt.s32.totalorder %s148_s29, %s148_s29 }
  0x24   : > { %p1548_p9 = scmp.lt.s32.totalorder %s1539_s9, %s1539_s9 }
  0x25   : > { %p1542_p5 = pnand %p1541_p11, %p1540_p10 }
  0x26   : > { %p1549_p8 = por %p1548_p9, %p1547_p13 }
  0x27   : > { %p1543_p0 = pneg %p1542_p5 }
  0x29   : > { %p1550_p1 = pnand %p1549_p8, %p1543_p0 }
  0x2b   : > { %1553 = shalt.err (!%p1550_p1)
}
  0x2c   : > { %s1672_s10 = smov [#allocation8]   ;;  %s3442_s6 = smov (%p1796_p6, %s33_s6), 0 }
  0x2d   : > { %1457 = dma.vmem_to_smem (!%p1791_p4), %s148_s29, 16, %s1672_s10, [#allocation7]  }
  0x2e   : > { %3165 = sst [smem:[#allocation21_spill]] %s3442_s6  ;;  %s1327_s11 = sshll.u32 %s161_s8, 6 }
  0x2f   : > { %s37_s12 = ssub.s32 %s1666_s18, %s3442_s6  ;;  %s1444_s13 = sshll.u32 %s1666_s18, 10 }
  0x30   : > { %p40_p9 = scmp.eq.s32.totalorder %s37_s12, 0  ;;  %s3166_s0 = sld [smem:[#allocation130_spill]] }
  0x31   : > { %s165_s27 = scalar_lea.vmem [#allocation4], %s1327_s11  ;;  %s1824_s5 = scalar_lea.sflag [#allocation5], %s161_s8 }
  0x32   : > { %s175_s28 = sshll.u32 %s165_s27, 4  ;;  %p1556_p13 = pneg %p1785_p2  ;;  %s1822_s28 = int_to_ptr.vmem [resolvable:$true] %s175_s28 }
  0x33   : > { %s1820_s29 = scalar_select %p40_p9, %s1658_s16, %s42_s21  }
  0x35   : > { %3167 = sst [smem:[#allocation22_spill]] %s1820_s29 }
  0x36   : > { %s1815_s23 = scalar_lea.hbm %s3166_s0, %s1444_s13  ;;  %s1559_s11 = scalar_lea.hbm %s3166_s0, 2048 }
  0x37   : > { %s1554_s7 = scalar_lea.hbm %s1815_s23, 1024  ;;  %p1560_p10 = scmp.lt.u32.totalorder %s1815_s23, %s3166_s0 }
  0x38   : > { %p1555_p8 = scmp.ne.s32.totalorder %s1815_s23, %s1554_s7  ;;  %p1561_p11 = scmp.lt.u32.totalorder %s1559_s11, %s1554_s7 }
  0x39   : > { %p1563_p0 = scmp.lt.u32.totalorder %s1554_s7, %s1815_s23 }
  0x3a   : > { %p1557_p4 = pnand %p1556_p13, %p1555_p8  ;;  %p1562_p5 = por %p1561_p11, %p1560_p10 }
  0x3c   : > { %p1558_p6 = pneg %p1557_p4  ;;  %p1564_p1 = por %p1563_p0, %p1562_p5 }
  0x3e   : > { %p1565_p9 = pnand %p1564_p1, %p1558_p6 }
  0x40   : > { %1568 = shalt.err (!%p1565_p9)
}
  0x41   : > { %s1569_s21 = scalar_lea.vmem %s1822_s28, 1024  ;;  %s1673_s8 = smov [#allocation4]  }
  0x42   : > { %p1570_p8 = scmp.ne.s32.totalorder %s1822_s28, %s1569_s21  ;;  %s1574_s2 = sshll.u32 %s1673_s8, 4  ;;  %s1575_s2 = int_to_ptr.vmem [resolvable:$false] %s1574_s2 }
  0x43   : > { %s1576_s20 = scalar_lea.vmem %s1575_s2, 2048  ;;  %p1577_p7 = scmp.lt.s32.totalorder %s1822_s28, %s1575_s2 }
  0x44   : > { %p1572_p4 = pnand %p1570_p8, %p1556_p13  ;;  %p1578_p10 = scmp.lt.s32.totalorder %s1576_s20, %s1569_s21 }
  0x46   : > { %p1573_p3 = pneg %p1572_p4  ;;  %p1579_p11 = por %p1578_p10, %p1577_p7 }
  0x48   : > { %p1580_p5 = pnand %p1579_p11, %p1573_p3 }
  0x4a   : > { %1583 = shalt.err (!%p1580_p5)
}
  0x4b   : > { %s1674_s27 = smov 128   ;;  %s1675_s7 = smov 8  }
  0x4c   : > { %1461 = dma.hbm_to_vmem [thread:$0]  (!%p1785_p2), %s1815_s23, 1024, %s1822_s28, %s1824_s5, %s1674_s27, %s1674_s27, %s1675_s7  }
  0x4d   : > { %187 = sbr.rel (%p1775_p12) target bundleno = 422 (0x1a6), region = 32 }
  0x54   : > { %s1855_s9 = sand.u32 1, %s1654_s15   ;;  %p3169_p3 = scmp.ne.s32.totalorder %s3155_s24, 0 }
  0x55   : > { %3168 = sst [smem:[#allocation23_spill]] %s1855_s9  ;;  %s1331_s10 = sshll.u32 %s1855_s9, 6 }
  0x56   : > { %s190_s11 = scalar_lea.sflag [#allocation5], %s1855_s9  ;;  %s193_s12 = scalar_lea.vmem [#allocation4], %s1331_s10 }
  0x57   : > { %1637 = dma.done.wait (%p3169_p3), %s190_s11, 1024  }
  0x58   : > { %1639 = vsyncadd (%p3169_p3), %s190_s11, 4294966272  ;;  %p3170_p7 = scmp.ne.s32.totalorder %s3153_s22, 0 }
  0x5a   : > { %1641 = dma.done.wait (%p3170_p7), [#allocation7], 16  }
  0x5b   : > { %1643 = vsyncadd (%p3170_p7), [#allocation7], 4294967280 }
  0x5c   : > { %202 = sfence }
  0x5d   : > { %v231_v0 = vld [vmem:[%s193_s12] sm:$0xff]  ;;  %v232_v1 = vld [vmem:[%s193_s12 + $0x8] sm:$0xff]  ;;  %v1334_v2 = vld [vmem:[%s193_s12 + $0x10] sm:$0xff]  ;;  %v1676_v3 = vmov 0.0   ;;  %v1677_v4 = vmov -inf   ;;  %vm260_vm0 = vcmask 130048   ;;  %v277_v22 = vlaneseq }
  0x5e   : > { %227 = vst [vmem:[#allocation2 + $0x8] sm:$0xff] %v1676_v3  ;;  %229 = vst [vmem:[#allocation2 + $0x18] sm:$0xff] %v1677_v4  ;;  %v1335_v5 = vld [vmem:[%s193_s12 + $0x18] sm:$0xff]  ;;  %v238_v6 = vadd.f32 %v1334_v2, %v231_v0  ;;  %v240_v7 = vmax.f32 %v231_v0, %v1334_v2  ;;  %v1336_v8 = vld [vmem:[%s193_s12 + $0x20] sm:$0xff]  ;;  %s1678_s22 = smov 3   ;;  %s1679_s24 = smov 2  }
  0x5f   : > { %v1337_v9 = vld [vmem:[%s193_s12 + $0x28] sm:$0xff]  ;;  %226 = vst [vmem:[#allocation2] sm:$0xff] %v1676_v3  ;;  %230 = vst [vmem:[#allocation2 + $0x20] sm:$0xff] %v1677_v4  ;;  %v239_v10 = vadd.f32 %v1335_v5, %v232_v1  ;;  %v1338_v11 = vld [vmem:[%s193_s12 + $0x30] sm:$0xff]  ;;  %v241_v12 = vmax.f32 %v232_v1, %v1335_v5  ;;  %v281_v23 = vand.u32 127, %v277_v22  ;;  %v1867_v24 = vshrl.u32 %v277_v22, 7 }
  0x60   : > { %v245_v13 = vadd.f32 %v1336_v8, %v238_v6  ;;  %v247_v14 = vmax.f32 %v240_v7, %v1336_v8  ;;  %v1339_v15 = vld [vmem:[%s193_s12 + $0x38] sm:$0xff]  ;;  %s1680_s30 = smov 1   ;;  %s1681_s4 = smov 127  }
  0x61   : > { %v246_v16 = vadd.f32 %v1337_v9, %v239_v10  ;;  %v248_v17 = vmax.f32 %v241_v12, %v1337_v9  ;;  %3171 = vst [vmem:[#allocation24_spill] sm:$0xff] %v1867_v24  ;;  %vm284_vm1 = vcmp.lt.s32.totalorder %v281_v23, 16  ;;  %vm295_vm2 = vcmp.lt.s32.totalorder %v1867_v24, 3  ;;  %s1682_s23 = smov 126   ;;  %s1683_s28 = smov 125  }
  0x62   : > { %v252_v18 = vadd.f32 %v1338_v11, %v245_v13  ;;  %v254_v19 = vmax.f32 %v247_v14, %v1338_v11  ;;  %s1932_s5 = sld [smem:[#allocation8 + $0x7]]  ;;  %s1934_s13 = sld [smem:[#allocation8 + $0xe]] }
  0x63   : > { %v253_v20 = vadd.f32 %v1339_v15, %v246_v16  ;;  %v255_v21 = vmax.f32 %v248_v17, %v1339_v15  ;;  %s1937_s21 = sld [smem:[#allocation8 + $0x15]]  ;;  %s1939_s8 = sld [smem:[#allocation8 + $0x1c]] }
  0x64   : > { %268 = vst.msk [vmem:[#allocation2 + $0x18] sm:$0xff] %vm260_vm0, %v254_v19  ;;  %261 = vst.msk [vmem:[#allocation2] sm:$0xff] %vm260_vm0, %v252_v18  ;;  %s1941_s2 = sld [smem:[#allocation8 + $0x23]]  ;;  %s1943_s20 = sld [smem:[#allocation8 + $0x2a]] }
  0x65   : > { %262 = vst.msk [vmem:[#allocation2 + $0x8] sm:$0xff] %vm260_vm0, %v253_v20  ;;  %269 = vst.msk [vmem:[#allocation2 + $0x20] sm:$0xff] %vm260_vm0, %v255_v21  ;;  %s1945_s27 = sld [smem:[#allocation8]]  ;;  %s1947_s7 = sld [smem:[#allocation8 + $0x1]] }
  0x66   : > { %s1950_s10 = sld [smem:[#allocation8 + $0x8]]  ;;  %s1952_s11 = sld [smem:[#allocation8 + $0xf]] }
  0x67   : > { %s1956_s12 = sld [smem:[#allocation8 + $0x16]]  ;;  %s1966_s0 = sld [smem:[#allocation8 + $0x9]] }
  0x68   : > { %s1972_s1 = sld [smem:[#allocation8 + $0x17]]  ;;  %s1976_s6 = sld [smem:[#allocation8 + $0x3]]  ;;  %v2029_v45 = vstv %s1932_s5  ;;  %v2032_v46 = vstv %s1934_s13 }
  0x69   : > { %s1978_s18 = sld [smem:[#allocation8 + $0x1e]]  ;;  %s1980_s29 = sld [smem:[#allocation8 + $0x25]]  ;;  %v2039_v47 = vstv %s1937_s21  ;;  %v2042_v48 = vstv %s1939_s8 }
  0x6a   : > { %s1982_s16 = sld [smem:[#allocation8 + $0x2c]]  ;;  %s1986_s19 = sld [smem:[#allocation8 + $0xa]]  ;;  %v2045_v49 = vstv %s1941_s2  ;;  %v2048_v50 = vstv %s1943_s20 }
  0x6b   : > { %v275_v25 = vld [vmem:[#allocation2 + $0x18] sm:$0xff]  ;;  %v273_v26 = vld [vmem:[#allocation2] sm:$0xff]  ;;  %3172 = sst [smem:[#allocation25_spill]] %s1945_s27  ;;  %s1984_s15 = sld [smem:[#allocation8 + $0x4]] }
  0x6c   : > { %v274_v27 = vld [vmem:[#allocation2 + $0x8] sm:$0xff]  ;;  %v291_v28 = vsel %vm284_vm1, %v275_v25, 0.0  ;;  %v287_v29 = vmul.f32 0.25, %v273_v26  ;;  %v276_v30 = vld [vmem:[#allocation2 + $0x20] sm:$0xff]  ;;  %3173 = sst [smem:[#allocation26_spill]] %s1947_s7  ;;  %s1988_s26 = sld [smem:[#allocation8 + $0x11]]  ;;  %v2057_v53 = vstv %s1950_s10  ;;  %v2060_v54 = vstv %s1952_s11 }
  0x6d   : > { %v288_v31 = vmul.f32 0.25, %v274_v27  ;;  %v302_v32 = vrot.slane %v291_v28, 5  ;;  %v292_v33 = vsel %vm284_vm1, %v276_v30, 0.0  ;;  %s1990_s14 = sld [smem:[#allocation8 + $0x18]]  ;;  %s1992_s3 = sld [smem:[#allocation8 + $0xb]]  ;;  %v2067_v55 = vstv %s1956_s12 }
  0x6e   : > { %v289_v34 = vsel %vm284_vm1, %v287_v29, 0.0  ;;  %v303_v35 = vrot.slane %v292_v33, 5  ;;  %3175 = sst [smem:[#allocation28_spill]] %s1972_s1  ;;  %s1994_s25 = sld [smem:[#allocation8 + $0x1f]]  ;;  %v571_v58 = vstv %s1976_s6  ;;  %v2091_v63 = vstv %s1966_s0 }
  0x6f   : > { %v290_v36 = vsel %vm284_vm1, %v288_v31, 0.0  ;;  %v293_v37 = vrot.slane %v289_v34, 5  ;;  %v1872_v38 = vsel %vm295_vm2, 0.0, %v302_v32  ;;  %3176 = sst [smem:[#allocation29_spill]] %s1978_s18  ;;  %s1998_s17 = sld [smem:[#allocation8 + $0x19]] }
  0x70   : > { %v294_v39 = vrot.slane %v290_v36, 5  ;;  %v1876_v40 = vsel %vm295_vm2, %v302_v32, %v303_v35  ;;  %307 = vst [vmem:[#allocation2 + $0x18] sm:$0xff] %v1872_v38  ;;  %v1881_v41 = vsel %vm295_vm2, %v303_v35, 0.0  ;;  %3177 = sst [smem:[#allocation30_spill]] %s1980_s29  ;;  %s2006_s29 = sld [smem:[#allocation8 + $0x2d]]  ;;  %v576_v61 = vstv %s1986_s19 }
  0x71   : > { %v1885_v42 = vsel %vm295_vm2, 0.0, %v293_v37  ;;  %308 = vst [vmem:[#allocation2 + $0x20] sm:$0xff] %v1876_v40  ;;  %3178 = sst [smem:[#allocation31_spill]] %s1982_s16  ;;  %s2000_s9 = sld [smem:[#allocation8 + $0x20]] }
  0x72   : > { %v1890_v43 = vsel %vm295_vm2, %v294_v39, 0.0  ;;  %v1894_v44 = vsel %vm295_vm2, %v293_v37, %v294_v39  ;;  %299 = vst [vmem:[#allocation2] sm:$0xff] %v1885_v42  ;;  %412 = vrot.lane.b32.xlu0 %v1885_v42, %s1678_s22  ;;  %3179 = sst [smem:[#allocation32_spill]] %s1984_s15  ;;  %s2002_s16 = sld [smem:[#allocation8 + $0x26]]  ;;  %v583_v62 = vstv %s1988_s26  ;;  %v2103_v3 = vmul.f32 %v571_v58, %v1885_v42 }
  0x73   : > { %416 = vrot.lane.b32.xlu1 %v1890_v43, %s1678_s22  ;;  %300 = vst [vmem:[#allocation2 + $0x8] sm:$0xff] %v1894_v44  ;;  %3180 = sst [smem:[#allocation33_spill]] %s1992_s3  ;;  %s2004_s15 = sld [smem:[#allocation8 + $0x27]]  ;;  %v590_v1 = vstv %s1990_s14  ;;  %v2123_v9 = vmul.f32 %v576_v61, %v1885_v42  ;;  %v2126_v10 = vmul.f32 %v583_v62, %v1885_v42  ;;  %v2161_v19 = vmul.f32 %v576_v61, %v1890_v43 }
  0x74   : > { %s2008_s18 = sld [smem:[#allocation8 + $0x2e]]  ;;  %s2010_s3 = sld [smem:[#allocation8 + $0x5]]  ;;  %v597_v2 = vstv %s1994_s25  ;;  %v2133_v11 = vmul.f32 %v590_v1, %v1885_v42  ;;  %v2164_v20 = vmul.f32 %v583_v62, %v1890_v43  ;;  %v2167_v21 = vmul.f32 %v590_v1, %v1890_v43 }
  0x75   : > { %3182 = sst [smem:[#allocation35_spill]] %s1998_s17  ;;  %s2014_s17 = sld [smem:[#allocation8 + $0x13]]  ;;  %3201 = vst [vmem:[#allocation44_spill] sm:$0xff] %v2126_v10  ;;  %v2136_v12 = vmul.f32 %v597_v2, %v1885_v42  ;;  %3208 = vst [vmem:[#allocation47_spill] sm:$0xff] %v2161_v19  ;;  %v2170_v22 = vmul.f32 %v597_v2, %v1890_v43  ;;  %v2199_v30 = vmul.f32 %v571_v58, %v1894_v44 }
  0x76   : > { %414 = vrot.lane.b32.xlu0 %v1894_v44, %s1678_s22  ;;  %3185 = sst [smem:[#allocation38_spill]] %s2006_s29  ;;  %s2016_s1 = sld [smem:[#allocation8 + $0x1a]]  ;;  %3204 = vst [vmem:[#allocation45_spill] sm:$0xff] %v2133_v11  ;;  %3209 = vst [vmem:[#allocation48_spill] sm:$0xff] %v2164_v20  ;;  %v2202_v31 = vmul.f32 %v576_v61, %v1894_v44  ;;  %v2209_v32 = vmul.f32 %v583_v62, %v1894_v44  ;;  %v2212_v33 = vmul.f32 %v590_v1, %v1894_v44 }
  0x77   : > { %465 = vrot.lane.b32.xlu1 %v1885_v42, %s1679_s24  ;;  %3183 = sst [smem:[#allocation36_spill]] %s2000_s9  ;;  %s2018_s9 = sld [smem:[#allocation8 + $0x21]]  ;;  %3205 = vst [vmem:[#allocation46_spill] sm:$0xff] %v2136_v12  ;;  %3210 = vst [vmem:[#allocation49_spill] sm:$0xff] %v2167_v21  ;;  %v2215_v34 = vmul.f32 %v597_v2, %v1894_v44 }
  0x78   : > { %s2022_s29 = sld [smem:[#allocation8 + $0x2f]]  ;;  %s2050_s5 = sld [smem:[#allocation8 + $0x22]]  ;;  %v604_v13 = vstv %s2002_s16  ;;  %3211 = vst [vmem:[#allocation50_spill] sm:$0xff] %v2170_v22  ;;  %3220 = vst [vmem:[#allocation55_spill] sm:$0xff] %v2199_v30 }
  0x79   : > { %3184 = sst [smem:[#allocation37_spill]] %s2004_s15  ;;  %s2020_s15 = sld [smem:[#allocation8 + $0x28]]  ;;  %v2177_v23 = vmul.f32 %v604_v13, %v1885_v42  ;;  %v2180_v25 = vmul.f32 %v604_v13, %v1890_v43  ;;  %3222 = vst [vmem:[#allocation56_spill] sm:$0xff] %v2202_v31  ;;  %3226 = vst [vmem:[#allocation57_spill] sm:$0xff] %v2209_v32  ;;  %v2218_v35 = vmul.f32 %v604_v13, %v1894_v44 }
  0x7a   : > { %467 = vrot.lane.b32.xlu0 %v1894_v44, %s1679_s24  ;;  %3186 = sst [smem:[#allocation39_spill]] %s2008_s18  ;;  %s2024_s18 = sld [smem:[#allocation8 + $0x6]]  ;;  %3227 = vst [vmem:[#allocation58_spill] sm:$0xff] %v2212_v33  ;;  %3228 = vst [vmem:[#allocation59_spill] sm:$0xff] %v2215_v34 }
  0x7b   : > { %469 = vrot.lane.b32.xlu1 %v1890_v43, %s1679_s24  ;;  %3187 = sst [smem:[#allocation40_spill]] %s2010_s3  ;;  %s2026_s3 = sld [smem:[#allocation8 + $0xd]]  ;;  %3214 = vst [vmem:[#allocation51_spill] sm:$0xff] %v2177_v23  ;;  %3215 = vst [vmem:[#allocation52_spill] sm:$0xff] %v2180_v25 }
  0x7c   : > { %3188 = sst [smem:[#allocation41_spill]] %s2016_s1  ;;  %s2034_s1 = sld [smem:[#allocation8 + $0x14]]  ;;  %3229 = vst [vmem:[#allocation60_spill] sm:$0xff] %v2218_v35 }
  0x7d   : > { %3189 = sst [smem:[#allocation42_spill]] %s2018_s9  ;;  %s2036_s9 = sld [smem:[#allocation8 + $0x1b]] }
  0x7e   : > { %518 = vrot.lane.b32.xlu0 %v1885_v42, %s1680_s30  ;;  %s2052_s13 = sld [smem:[#allocation8 + $0x29]]  ;;  %s2062_s21 = sld [smem:[#allocation8 + $0x30]] }
  0x7f   : > { %520 = vrot.lane.b32.xlu1 %v1894_v44, %s1680_s30  ;;  %s2064_s8 = sld [smem:[#allocation8 + $0x31]]  ;;  %s3191_s2 = sld [smem:[#allocation28_spill]]  ;;  %v2245_v61 = vstv %s2020_s15 }
  0x80   : > { %s2076_s20 = sld [smem:[#allocation8 + $0x38]]  ;;  %s3192_s10 = sld [smem:[#allocation29_spill]]  ;;  %3237 = vst [vmem:[#allocation66_spill] sm:$0xff] %v2245_v61 }
  0x81   : > { %s2078_s11 = sld [smem:[#allocation8 + $0x3f]]  ;;  %s3193_s7 = sld [smem:[#allocation30_spill]]  ;;  %v2256_v1 = vstv %s2026_s3 }
  0x82   : > { %522 = vrot.lane.b32.xlu0 %v1890_v43, %s1680_s30  ;;  %s3195_s12 = sld [smem:[#allocation31_spill]]  ;;  %s2098_s6 = sld [smem:[#allocation8 + $0x54]]  ;;  %3239 = vst [vmem:[#allocation68_spill] sm:$0xff] %v2256_v1  ;;  %v2259_v2 = vstv %s2034_s1 }
  0x83   : > { %618 = vrot.lane.b32.xlu1 %v1885_v42, %s1681_s4  ;;  %s3196_s19 = sld [smem:[#allocation33_spill]]  ;;  %s3197_s26 = sld [smem:[#allocation38_spill]]  ;;  %3240 = vst [vmem:[#allocation69_spill] sm:$0xff] %v2259_v2  ;;  %v2262_v13 = vstv %s2036_s9 }
  0x84   : > { %s3199_s14 = sld [smem:[#allocation35_spill]]  ;;  %s2116_s25 = sld [smem:[#allocation8 + $0x39]]  ;;  %3241 = vst [vmem:[#allocation70_spill] sm:$0xff] %v2262_v13  ;;  %v2272_v37 = vstv %s2052_s13  ;;  %v2275_v7 = vstv %s2062_s21 }
  0x85   : > { %3190 = sst [smem:[#allocation43_spill]] %s2064_s8  ;;  %s2086_s8 = sld [smem:[#allocation8 + $0x46]]  ;;  %v2106_v4 = vstv %s3191_s2  ;;  %3243 = vst [vmem:[#allocation72_spill] sm:$0xff] %v2272_v37  ;;  %3244 = vst [vmem:[#allocation73_spill] sm:$0xff] %v2275_v7 }
  0x86   : > { %620 = vrot.lane.b32.xlu0 %v1894_v44, %s1681_s4  ;;  %v2109_v5 = vstv %s3192_s10  ;;  %s2128_s2 = sld [smem:[#allocation8 + $0x40]]  ;;  %s2142_s10 = sld [smem:[#allocation8 + $0x4e]]  ;;  %v2283_v60 = vstv %s2076_s20 }
  0x87   : > { %622 = vrot.lane.b32.xlu1 %v1890_v43, %s1681_s4  ;;  %v2112_v6 = vstv %s3193_s7  ;;  %s2130_s7 = sld [smem:[#allocation8 + $0x47]]  ;;  %s2144_s27 = sld [smem:[#allocation8 + $0x55]]  ;;  %3247 = vst [vmem:[#allocation74_spill] sm:$0xff] %v2283_v60  ;;  %v2286_v52 = vstv %s2078_s11 }
  0x88   : > { %v2120_v8 = vstv %s3195_s12  ;;  %s3206_s12 = sld [smem:[#allocation37_spill]]  ;;  %s2172_s16 = sld [smem:[#allocation8 + $0x3a]]  ;;  %3248 = vst [vmem:[#allocation75_spill] sm:$0xff] %v2286_v52  ;;  %v2300_v7 = vstv %s2098_s6 }
  0x89   : > { %v2140_v14 = vstv %s3196_s19  ;;  %v611_v15 = vstv %s3197_s26  ;;  %s2174_s19 = sld [smem:[#allocation8 + $0x41]]  ;;  %s3216_s26 = sld [smem:[#allocation40_spill]]  ;;  %3252 = vst [vmem:[#allocation78_spill] sm:$0xff] %v2300_v7 }
  0x8a   : > { %671 = vrot.lane.b32.xlu0 %v1885_v42, %s1682_s23  ;;  %v2151_v17 = vstv %s3199_s14  ;;  %s2190_s14 = sld [smem:[#allocation8 + $0x48]]  ;;  %v2193_v28 = vmul.f32 %v611_v15, %v1885_v42  ;;  %v2196_v29 = vmul.f32 %v611_v15, %v1890_v43  ;;  %v2225_v36 = vmul.f32 %v611_v15, %v1894_v44  ;;  %s2264_s15 = sld [smem:[#allocation8 + $0x3c]] }
  0x8b   : > { %673 = vrot.lane.b32.xlu1 %v1894_v44, %s1682_s23  ;;  %v2269_v15 = vstv %s2050_s5  ;;  %s2280_s9 = sld [smem:[#allocation8 + $0x57]]  ;;  %v2289_v51 = vstv %s2086_s8  ;;  %s2294_s5 = sld [smem:[#allocation8 + $0x51]]  ;;  %v2306_v60 = vstv %s2116_s25 }
  0x8c   : > { %3202 = sst [smem:[#allocation28_spill]] %s2128_s2  ;;  %s2158_s2 = sld [smem:[#allocation8 + $0x33]]  ;;  %3218 = vst [vmem:[#allocation53_spill] sm:$0xff] %v2193_v28  ;;  %3219 = vst [vmem:[#allocation54_spill] sm:$0xff] %v2196_v29  ;;  %v2319_v52 = vstv %s2142_s10 }
  0x8d   : > { %3203 = sst [smem:[#allocation29_spill]] %s2130_s7  ;;  %s2156_s7 = sld [smem:[#allocation8 + $0x5c]]  ;;  %3231 = vst [vmem:[#allocation61_spill] sm:$0xff] %v2225_v36  ;;  %3242 = vst [vmem:[#allocation71_spill] sm:$0xff] %v2269_v15 }
  0x8e   : > { %675 = vrot.lane.b32.xlu0 %v1890_v43, %s1682_s23  ;;  %3212 = sst [smem:[#allocation30_spill]] %s2172_s16  ;;  %v2183_v26 = vstv %s3206_s12  ;;  %s2204_s12 = sld [smem:[#allocation8 + $0x4f]]  ;;  %3249 = vst [vmem:[#allocation76_spill] sm:$0xff] %v2289_v51  ;;  %3255 = vst [vmem:[#allocation80_spill] sm:$0xff] %v2306_v60  ;;  %v2327_v60 = vstv %s2144_s27 }
  0x8f   : > { %724 = vrot.lane.b32.xlu1 %v1885_v42, %s1683_s28  ;;  %3213 = sst [smem:[#allocation31_spill]] %s2174_s19  ;;  %s2206_s19 = sld [smem:[#allocation8 + $0x56]]  ;;  %v2232_v42 = vstv %s2014_s17  ;;  %3258 = vst [vmem:[#allocation83_spill] sm:$0xff] %v2319_v52  ;;  %3262 = vst [vmem:[#allocation84_spill] sm:$0xff] %v2327_v60 }
  0x90   : > { %3217 = sst [smem:[#allocation33_spill]] %s2190_s14  ;;  %3233 = vst [vmem:[#allocation63_spill] sm:$0xff] %v2232_v42  ;;  %s2236_s16 = sld [smem:[#allocation8 + $0x50]] }
  0x91   : > { %s2220_s14 = sld [smem:[#allocation8 + $0x3b]]  ;;  %s2252_s17 = sld [smem:[#allocation8 + $0x5d]] }
  0x92   : > { %726 = vrot.lane.b32.xlu0 %v1894_v44, %s1683_s28  ;;  %v2248_v44 = vstv %s2022_s29  ;;  %s2266_s29 = sld [smem:[#allocation8 + $0x43]]  ;;  %s3245_s3 = sld [smem:[#allocation28_spill]] }
  0x93   : > { %728 = vrot.lane.b32.xlu1 %v1890_v43, %s1683_s28  ;;  %3238 = vst [vmem:[#allocation67_spill] sm:$0xff] %v2248_v44  ;;  %s3246_s1 = sld [smem:[#allocation29_spill]]  ;;  %s2296_s13 = sld [smem:[#allocation8 + $0x5e]] }
  0x94   : > { %3224 = sst [smem:[#allocation38_spill]] %s2204_s12  ;;  %s2222_s12 = sld [smem:[#allocation8 + $0x42]] }
  0x95   : > { %s3254_s20 = sld [smem:[#allocation30_spill]]  ;;  %s2310_s11 = sld [smem:[#allocation8 + $0x5f]] }
  0x96   : > { %782 = vrot.lane.b32.xlu0 %v1872_v38, %s1678_s22  ;;  %s2308_s8 = sld [smem:[#allocation8 + $0x58]]  ;;  %s2322_s6 = sld [smem:[#allocation8 + $0x36]]  ;;  %v967_v13 = vstv %s2236_s16 }
  0x97   : > { %784 = vrot.lane.b32.xlu1 %v1876_v40, %s1678_s22  ;;  %3230 = sst [smem:[#allocation35_spill]] %s2220_s14  ;;  %s2336_s10 = sld [smem:[#allocation8 + $0x4b]]  ;;  %v2369_v44 = vstv %s2252_s17  ;;  %v2413_v61 = vmul.f32 %v967_v13, %v1881_v41 }
  0x98   : > { %s3234_s14 = sld [smem:[#allocation43_spill]]  ;;  %s2346_s27 = sld [smem:[#allocation8 + $0x59]]  ;;  %3271 = vst [vmem:[#allocation92_spill] sm:$0xff] %v2369_v44 }
  0x99   : > { %s3251_s21 = sld [smem:[#allocation35_spill]]  ;;  %v2316_v51 = vstv %s3246_s1  ;;  %s2334_s1 = sld [smem:[#allocation8 + $0x44]]  ;;  %v981_v44 = vstv %s2296_s13  ;;  %3281 = vst [vmem:[#allocation102_spill] sm:$0xff] %v2413_v61 }
  0x9a   : > { %786 = vrot.lane.b32.xlu0 %v1881_v41, %s1678_s22  ;;  %s1958_s22 = sld [smem:[#allocation8 + $0x1d]]  ;;  %3257 = vst [vmem:[#allocation82_spill] sm:$0xff] %v2316_v51  ;;  %v953_v51 = vstv %s2222_s12  ;;  %s2376_s12 = sld [smem:[#allocation8 + $0x4c]]  ;;  %v2434_v61 = vmul.f32 %v981_v44, %v1881_v41 }
  0x9b   : > { %835 = vrot.lane.b32.xlu1 %v1872_v38, %s1679_s24  ;;  %s2324_s25 = sld [smem:[#allocation8 + $0x3d]]  ;;  %v2339_v52 = vstv %s3254_s20  ;;  %s2388_s17 = sld [smem:[#allocation8 + $0x53]] }
  0x9c   : > { %3265 = vst [vmem:[#allocation86_spill] sm:$0xff] %v2339_v52  ;;  %s2374_s16 = sld [smem:[#allocation8 + $0x45]]  ;;  %v2385_v52 = vmul.f32 %v967_v13, %v1872_v38  ;;  %s2402_s20 = sld [smem:[#allocation8 + $0x61]]  ;;  %3288 = vst [vmem:[#allocation109_spill] sm:$0xff] %v2434_v61 }
  0x9e   : > { %837 = vrot.lane.b32.xlu0 %v1876_v40, %s1679_s24  ;;  %3275 = vst [vmem:[#allocation96_spill] sm:$0xff] %v2385_v52  ;;  %v2407_v52 = vmul.f32 %v953_v51, %v1881_v41 }
  0x9f   : > { %839 = vrot.lane.b32.xlu1 %v1881_v41, %s1679_s24  ;;  %s1960_s24 = sld [smem:[#allocation8 + $0x24]]  ;;  %v946_v15 = vstv %s3251_s21  ;;  %s2390_s21 = sld [smem:[#allocation8 + $0x5a]] }
  0xa0   : > { %v2070_v56 = vstv %s1958_s22  ;;  %s2088_s22 = sld [smem:[#allocation8 + $0x4d]]  ;;  %3279 = vst [vmem:[#allocation100_spill] sm:$0xff] %v2407_v52  ;;  %v2428_v52 = vstv %s2308_s8 }
  0xa1   : > { %3286 = vst [vmem:[#allocation107_spill] sm:$0xff] %v2428_v52  ;;  %v2446_v52 = vmul.f32 %v953_v51, %v1876_v40 }
  0xa2   : > { %888 = vrot.lane.b32.xlu0 %v1872_v38, %s1680_s30 }
  0xa3   : > { %890 = vrot.lane.b32.xlu1 %v1876_v40, %s1680_s30  ;;  %3292 = vst [vmem:[#allocation113_spill] sm:$0xff] %v2446_v52 }
  0xa5   : > { %v2073_v57 = vstv %s1960_s24  ;;  %s2100_s24 = sld [smem:[#allocation8 + $0x5b]] }
  0xa6   : > { %892 = vrot.lane.b32.xlu0 %v1881_v41, %s1680_s30  ;;  %s1962_s30 = sld [smem:[#allocation8 + $0x2b]]  ;;  %v2292_v24 = vstv %s2088_s22  ;;  %s3259_s22 = sld [smem:[#allocation31_spill]] }
  0xa7   : > { %988 = vrot.lane.b32.xlu1 %v1872_v38, %s1681_s4  ;;  %3250 = vst [vmem:[#allocation77_spill] sm:$0xff] %v2292_v24  ;;  %v2313_v24 = vstv %s3245_s3 }
  0xa8   : > { %3256 = vst [vmem:[#allocation81_spill] sm:$0xff] %v2313_v24 }
  0xaa   : > { %990 = vrot.lane.b32.xlu0 %v1876_v40, %s1681_s4 }
  0xab   : > { %992 = vrot.lane.b32.xlu1 %v1881_v41, %s1681_s4  ;;  %s1964_s4 = sld [smem:[#allocation8 + $0x2]]  ;;  %v2303_v37 = vstv %s2100_s24  ;;  %s3260_s24 = sld [smem:[#allocation33_spill]] }
  0xac   : > { %v2081_v59 = vstv %s1962_s30  ;;  %s2114_s30 = sld [smem:[#allocation8 + $0x32]]  ;;  %3253 = vst [vmem:[#allocation79_spill] sm:$0xff] %v2303_v37  ;;  %v2330_v37 = vstv %s2156_s7  ;;  %s2360_s7 = sld [smem:[#allocation8 + $0x60]] }
  0xad   : > { %3263 = vst [vmem:[#allocation85_spill] sm:$0xff] %v2330_v37  ;;  %v2352_v37 = vstv %s3259_s22  ;;  %s2404_s22 = sld [smem:[#allocation8 + $0x37]] }
  0xae   : > { %1041 = vrot.lane.b32.xlu0 %v1872_v38, %s1682_s23  ;;  %3267 = vst [vmem:[#allocation88_spill] sm:$0xff] %v2352_v37  ;;  %v2397_v37 = vstv %s2264_s15  ;;  %s3297_s15 = sld [smem:[#allocation25_spill]] }
  0xaf   : > { %1043 = vrot.lane.b32.xlu1 %v1876_v40, %s1682_s23  ;;  %3277 = vst [vmem:[#allocation98_spill] sm:$0xff] %v2397_v37 }
  0xb1   : > { %3174 = sst [smem:[#allocation27_spill]] %s1964_s4  ;;  %s3207_s4 = sld [smem:[#allocation39_spill]]  ;;  %v2355_v60 = vstv %s3260_s24 }
  0xb2   : > { %1045 = vrot.lane.b32.xlu0 %v1881_v41, %s1682_s23  ;;  %s1970_s23 = sld [smem:[#allocation8 + $0x10]]  ;;  %3268 = vst [vmem:[#allocation89_spill] sm:$0xff] %v2355_v60 }
  0xb3   : > { %1094 = vrot.lane.b32.xlu1 %v1872_v38, %s1683_s28 }
  0xb6   : > { %1096 = vrot.lane.b32.xlu0 %v1876_v40, %s1683_s28 }
  0xb7   : > { %1098 = vrot.lane.b32.xlu1 %v1881_v41, %s1683_s28  ;;  %s1996_s28 = sld [smem:[#allocation8 + $0x12]]  ;;  %v2186_v27 = vstv %s3207_s4  ;;  %s3223_s4 = sld [smem:[#allocation42_spill]] }
  0xb8   : > { %v2094_v0 = vstv %s1970_s23  ;;  %s3200_s23 = sld [smem:[#allocation36_spill]] }
  0xbd   : > { %3181 = sst [smem:[#allocation34_spill]] %s1996_s28  ;;  %v2242_v58 = vstv %s3223_s4  ;;  %s3261_s4 = sld [smem:[#allocation38_spill]] }
  0xbe   : > { %s2012_s28 = sld [smem:[#allocation8 + $0xc]]  ;;  %v2154_v18 = vstv %s3200_s23  ;;  %s3221_s23 = sld [smem:[#allocation41_spill]]  ;;  %3236 = vst [vmem:[#allocation65_spill] sm:$0xff] %v2242_v58  ;;  %v2425_v58 = vstv %s2294_s5 }
  0xbf   : > { %s3198_s0 = sld [smem:[#allocation34_spill]]  ;;  %3285 = vst [vmem:[#allocation106_spill] sm:$0xff] %v2425_v58 }
  0xc0   : > { %3225 = sst [smem:[#allocation34_spill]] %s2206_s19  ;;  %s2234_s19 = sld [smem:[#allocation8 + $0x49]] }
  0xc1   : > { %s3264_s3 = sld [smem:[#allocation34_spill]] }
  0xc3   : > { %v2358_v2 = vstv %s3261_s4 }
  0xc4   : > { %v2229_v39 = vstv %s2012_s28  ;;  %v2239_v43 = vstv %s3221_s23  ;;  %s2250_s28 = sld [smem:[#allocation8 + $0x35]]  ;;  %s2278_s23 = sld [smem:[#allocation8 + $0x4a]]  ;;  %3269 = vst [vmem:[#allocation90_spill] sm:$0xff] %v2358_v2  ;;  %v2379_v2 = vmul.f32 %v953_v51, %v1872_v38  ;;  %v2462_v51 = vstv %s2324_s25 }
  0xc5   : > { %v2148_v16 = vstv %s3198_s0  ;;  %s2188_s0 = sld [smem:[#allocation8 + $0x34]]  ;;  %3232 = vst [vmem:[#allocation62_spill] sm:$0xff] %v2229_v39  ;;  %3235 = vst [vmem:[#allocation64_spill] sm:$0xff] %v2239_v43  ;;  %v3313_v39 = vstv %s3297_s15 }
  0xc6   : > { %v960_v24 = vstv %s2234_s19  ;;  %s2362_s19 = sld [smem:[#allocation8 + $0x3e]]  ;;  %3273 = vst [vmem:[#allocation94_spill] sm:$0xff] %v2379_v2  ;;  %v2400_v2 = vstv %s2266_s29  ;;  %3298 = vst [vmem:[#allocation118_spill] sm:$0xff] %v2462_v51  ;;  %v2492_v51 = vstv %s2390_s21  ;;  %s3311_s29 = sld [smem:[#allocation26_spill]] }
  0xc7   : > { %v2366_v1 = vstv %s3264_s3  ;;  %v2382_v60 = vmul.f32 %v960_v24, %v1872_v38  ;;  %3278 = vst [vmem:[#allocation99_spill] sm:$0xff] %v2400_v2  ;;  %3308 = vst [vmem:[#allocation128_spill] sm:$0xff] %v2492_v51  ;;  %s1684_s3 = smov [#allocation9]  }
  0xc8   : > { %3270 = vst [vmem:[#allocation91_spill] sm:$0xff] %v2366_v1  ;;  %v974_v1 = vstv %s2280_s9  ;;  %s3317_s9 = sld [smem:[#allocation32_spill]] }
  0xc9   : > { %3274 = vst [vmem:[#allocation95_spill] sm:$0xff] %v2382_v60  ;;  %v2410_v60 = vmul.f32 %v960_v24, %v1881_v41  ;;  %v2419_v37 = vmul.f32 %v974_v1, %v1872_v38  ;;  %v2422_v2 = vmul.f32 %v974_v1, %v1881_v41 }
  0xcb   : > { %v941_v62 = vstv %s2188_s0  ;;  %s2344_s0 = sld [smem:[#allocation8 + $0x52]]  ;;  %3280 = vst [vmem:[#allocation101_spill] sm:$0xff] %v2410_v60  ;;  %3283 = vst [vmem:[#allocation104_spill] sm:$0xff] %v2419_v37  ;;  %v2431_v60 = vmul.f32 %v981_v44, %v1872_v38 }
  0xcc   : > { %v2349_v7 = vmul.f32 %v941_v62, %v1872_v38  ;;  %3284 = vst [vmem:[#allocation105_spill] sm:$0xff] %v2422_v2  ;;  %v2440_v37 = vmul.f32 %v941_v62, %v1876_v40  ;;  %v2443_v2 = vmul.f32 %v946_v15, %v1876_v40  ;;  %v2455_v62 = vmul.f32 %v974_v1, %v1876_v40 }
  0xcd   : > { %3287 = vst [vmem:[#allocation108_spill] sm:$0xff] %v2431_v60  ;;  %v3312_v43 = vstv %s3311_s29  ;;  %v3314_v10 = vstv %s3311_s29 }
  0xce   : > { %3266 = vst [vmem:[#allocation87_spill] sm:$0xff] %v2349_v7  ;;  %v2372_v7 = vmul.f32 %v946_v15, %v1872_v38  ;;  %3290 = vst [vmem:[#allocation111_spill] sm:$0xff] %v2440_v37  ;;  %v2449_v38 = vmul.f32 %v960_v24, %v1876_v40  ;;  %v2465_v24 = vstv %s2334_s1  ;;  %v2480_v37 = vstv %s2362_s19  ;;  %s1588_s1 = sshll.u32 %s1684_s3, 4  ;;  %s1589_s1 = int_to_ptr.vmem [resolvable:$false] %s1588_s1 }
  0xcf   : > { %3291 = vst [vmem:[#allocation112_spill] sm:$0xff] %v2443_v2  ;;  %3295 = vst [vmem:[#allocation116_spill] sm:$0xff] %v2455_v62  ;;  %v2477_v62 = vstv %s2360_s7  ;;  %v2489_v2 = vstv %s2388_s17 }
  0xd0   : > { %3272 = vst [vmem:[#allocation93_spill] sm:$0xff] %v2372_v7  ;;  %v2393_v7 = vmul.f32 %v946_v15, %v1881_v41  ;;  %3293 = vst [vmem:[#allocation114_spill] sm:$0xff] %v2449_v38  ;;  %v2452_v41 = vmul.f32 %v967_v13, %v1876_v40  ;;  %v2458_v15 = vmul.f32 %v981_v44, %v1876_v40  ;;  %v2468_v38 = vstv %s2336_s10  ;;  %s1590_s10 = scalar_lea.vmem %s1589_s1, 512 }
  0xd1   : > { %3299 = vst [vmem:[#allocation119_spill] sm:$0xff] %v2465_v24  ;;  %3300 = vst [vmem:[#allocation120_spill] sm:$0xff] %v2468_v38  ;;  %v2471_v13 = vstv %s2344_s0  ;;  %v2483_v40 = vstv %s2374_s16  ;;  %v2486_v44 = vstv %s2376_s12  ;;  %v2495_v24 = vstv %s2402_s20 }
  0xd2   : > { %3276 = vst [vmem:[#allocation97_spill] sm:$0xff] %v2393_v7  ;;  %v2416_v7 = vstv %s2278_s23  ;;  %3294 = vst [vmem:[#allocation115_spill] sm:$0xff] %v2452_v41  ;;  %v2474_v41 = vstv %s2346_s27  ;;  %s3315_s23 = sld [smem:[#allocation27_spill]] }
  0xd3   : > { %3282 = vst [vmem:[#allocation103_spill] sm:$0xff] %v2416_v7  ;;  %v2437_v7 = vstv %s2310_s11  ;;  %3296 = vst [vmem:[#allocation117_spill] sm:$0xff] %v2458_v15  ;;  %v3310_v15 = vstv %s3297_s15 }
  0xd4   : > { %3289 = vst [vmem:[#allocation110_spill] sm:$0xff] %v2437_v7  ;;  %3301 = vst [vmem:[#allocation121_spill] sm:$0xff] %v2471_v13 }
  0xd5   : > { %3302 = vst [vmem:[#allocation122_spill] sm:$0xff] %v2474_v41  ;;  %3303 = vst [vmem:[#allocation123_spill] sm:$0xff] %v2477_v62 }
  0xd6   : > { %3304 = vst [vmem:[#allocation124_spill] sm:$0xff] %v2480_v37  ;;  %3305 = vst [vmem:[#allocation125_spill] sm:$0xff] %v2483_v40 }
  0xd7   : > { %3306 = vst [vmem:[#allocation126_spill] sm:$0xff] %v2486_v44  ;;  %3307 = vst [vmem:[#allocation127_spill] sm:$0xff] %v2489_v2 }
  0xd8   : > { %3309 = vst [vmem:[#allocation129_spill] sm:$0xff] %v2495_v24 }
  0xe4   : > { %v413_v52 = vpop.permute.xlu0 %412 }
  0xe5   : > { %v417_v1 = vpop.permute.xlu1 %416  ;;  %v419_v13 = vmul.f32 %v3310_v15, %v413_v52  ;;  %v424_v41 = vmul.f32 %v2029_v45, %v413_v52  ;;  %v431_v62 = vmul.f32 %v2032_v46, %v413_v52  ;;  %v438_v37 = vmul.f32 %v2039_v47, %v413_v52 }
  0xe6   : > { %v426_v40 = vmul.f32 %v2029_v45, %v417_v1  ;;  %v433_v44 = vmul.f32 %v2032_v46, %v417_v1  ;;  %v440_v2 = vmul.f32 %v2039_v47, %v417_v1  ;;  %v447_v51 = vmul.f32 %v2042_v48, %v417_v1 }
  0xe7   : > { %v454_v38 = vmul.f32 %v2045_v49, %v417_v1  ;;  %v461_v15 = vmul.f32 %v2048_v50, %v417_v1  ;;  %v445_v61 = vmul.f32 %v2042_v48, %v413_v52  ;;  %v452_v60 = vmul.f32 %v2045_v49, %v413_v52 }
  0xe8   : > { %v415_v24 = vpop.permute.xlu0 %414  ;;  %v459_v58 = vmul.f32 %v2048_v50, %v413_v52 }
  0xe9   : > { %v466_v7 = vpop.permute.xlu1 %465  ;;  %v420_v36 = vmul.f32 %v3313_v39, %v415_v24  ;;  %v425_v35 = vmul.f32 %v2029_v45, %v415_v24  ;;  %v432_v34 = vmul.f32 %v2032_v46, %v415_v24  ;;  %v439_v31 = vmul.f32 %v2039_v47, %v415_v24 }
  0xea   : > { %v472_v42 = vmul.f32 %v3312_v43, %v466_v7  ;;  %v477_v33 = vmul.f32 %v2057_v53, %v466_v7  ;;  %v484_v32 = vmul.f32 %v2060_v54, %v466_v7  ;;  %v491_v1 = vmul.f32 %v2067_v55, %v466_v7 }
  0xeb   : > { %v498_v30 = vmul.f32 %v2070_v56, %v466_v7  ;;  %v505_v52 = vmul.f32 %v2073_v57, %v466_v7  ;;  %v512_v43 = vmul.f32 %v2081_v59, %v466_v7  ;;  %v446_v45 = vmul.f32 %v2042_v48, %v415_v24 }
  0xec   : > { %v468_v29 = vpop.permute.xlu0 %467  ;;  %v474_v39 = vadd.f32 %v472_v42, %v419_v13  ;;  %v453_v46 = vmul.f32 %v2045_v49, %v415_v24  ;;  %v460_v28 = vmul.f32 %v2048_v50, %v415_v24  ;;  %v480_v22 = vadd.f32 %v477_v33, %v424_v41 }
  0xed   : > { %v470_v25 = vpop.permute.xlu1 %469  ;;  %v487_v21 = vadd.f32 %v484_v32, %v431_v62  ;;  %v494_v11 = vadd.f32 %v491_v1, %v438_v37  ;;  %v501_v48 = vadd.f32 %v498_v30, %v445_v61  ;;  %v508_v13 = vadd.f32 %v505_v52, %v452_v60 }
  0xee   : > { %v479_v23 = vmul.f32 %v2057_v53, %v470_v25  ;;  %v486_v47 = vmul.f32 %v2060_v54, %v470_v25  ;;  %v493_v12 = vmul.f32 %v2067_v55, %v470_v25  ;;  %v500_v7 = vmul.f32 %v2070_v56, %v470_v25 }
  0xef   : > { %v507_v42 = vmul.f32 %v2073_v57, %v470_v25  ;;  %v514_v49 = vmul.f32 %v2081_v59, %v470_v25  ;;  %v515_v50 = vadd.f32 %v512_v43, %v459_v58  ;;  %v473_v33 = vmul.f32 %v3314_v10, %v468_v29 }
  0xf0   : > { %v482_v24 = vadd.f32 %v479_v23, %v426_v40  ;;  %v489_v20 = vadd.f32 %v486_v47, %v433_v44  ;;  %v478_v41 = vmul.f32 %v2057_v53, %v468_v29  ;;  %v496_v32 = vadd.f32 %v493_v12, %v440_v2  ;;  %v519_v60 = vpop.permute.xlu0 %518 }
  0xf1   : > { %v521_v19 = vpop.permute.xlu1 %520  ;;  %v485_v37 = vmul.f32 %v2060_v54, %v468_v29  ;;  %v492_v62 = vmul.f32 %v2067_v55, %v468_v29  ;;  %v499_v30 = vmul.f32 %v2070_v56, %v468_v29  ;;  %v503_v61 = vadd.f32 %v500_v7, %v447_v51 }
  0xf2   : > { %v510_v25 = vadd.f32 %v507_v42, %v454_v38  ;;  %v506_v23 = vmul.f32 %v2073_v57, %v468_v29  ;;  %v513_v58 = vmul.f32 %v2081_v59, %v468_v29  ;;  %v517_v40 = vadd.f32 %v514_v49, %v461_v15 }
  0xf3   : > { %v475_v10 = vadd.f32 %v473_v33, %v420_v36  ;;  %v481_v44 = vadd.f32 %v478_v41, %v425_v35  ;;  %v3316_v53 = vstv %s3315_s23  ;;  %v488_v12 = vadd.f32 %v485_v37, %v432_v34 }
  0xf4   : > { %v526_v1 = vmul.f32 %v3316_v53, %v521_v19  ;;  %v495_v2 = vadd.f32 %v492_v62, %v439_v31  ;;  %v3318_v54 = vmov %v3316_v53  ;;  %v530_v56 = vmul.f32 %v2091_v63, %v519_v60 }
  0xf5   : > { %v525_v52 = vmul.f32 %v3318_v54, %v519_v60  ;;  %v619_v55 = vpop.permute.xlu1 %618  ;;  %v502_v43 = vadd.f32 %v499_v30, %v446_v45  ;;  %v531_v38 = vmul.f32 %v2091_v63, %v521_v19  ;;  %v537_v57 = vmul.f32 %v2094_v0, %v519_v60  ;;  %v523_v45 = vpop.permute.xlu0 %522 }
  0xf6   : > { %v538_v59 = vmul.f32 %v2094_v0, %v521_v19  ;;  %v509_v29 = vadd.f32 %v506_v23, %v453_v46  ;;  %v516_v36 = vadd.f32 %v513_v58, %v460_v28  ;;  %v544_v51 = vmul.f32 %v2106_v4, %v519_v60 }
  0xf7   : > { %v527_v35 = vadd.f32 %v525_v52, %v474_v39  ;;  %v2551_v15 = vadd.f32 %v526_v1, %v475_v10  ;;  %v3319_v31 = vstv %s3317_s9  ;;  %v545_v47 = vmul.f32 %v2106_v4, %v521_v19 }
  0xf8   : > { %v625_v34 = vmul.f32 %v3319_v31, %v619_v55  ;;  %v551_v7 = vmul.f32 %v2109_v5, %v519_v60  ;;  %v533_v49 = vadd.f32 %v530_v56, %v480_v22  ;;  %v2558_v33 = vadd.f32 %v531_v38, %v481_v44 }
  0xf9   : > { %v574_v42 = vadd.f32 %v2103_v3, %v527_v35  ;;  %v552_v46 = vmul.f32 %v2109_v5, %v521_v19  ;;  %v540_v28 = vadd.f32 %v537_v57, %v487_v21  ;;  %v2561_v39 = vadd.f32 %v538_v59, %v488_v12  ;;  %v3322_v59 = vld [vmem:[#allocation48_spill] sm:$0xff] }
  0xfa   : > { %v558_v41 = vmul.f32 %v2112_v6, %v519_v60  ;;  %v559_v37 = vmul.f32 %v2112_v6, %v521_v19  ;;  %v547_v62 = vadd.f32 %v544_v51, %v494_v11  ;;  %v565_v30 = vmul.f32 %v2120_v8, %v519_v60  ;;  %v3324_v51 = vld [vmem:[#allocation49_spill] sm:$0xff] }
  0xfb   : > { %v566_v23 = vmul.f32 %v2120_v8, %v521_v19  ;;  %v532_v58 = vmul.f32 %v2091_v63, %v523_v45  ;;  %v2568_v3 = vadd.f32 %v625_v34, %v574_v42  ;;  %v2570_v22 = vadd.f32 %v545_v47, %v495_v2  ;;  %v3326_v34 = vld [vmem:[#allocation50_spill] sm:$0xff]  ;;  %v621_v42 = vpop.permute.xlu0 %620 }
  0xfc   : > { %v554_v10 = vadd.f32 %v551_v7, %v501_v48  ;;  %v539_v21 = vmul.f32 %v2094_v0, %v523_v45  ;;  %v2573_v44 = vadd.f32 %v552_v46, %v502_v43  ;;  %v561_v53 = vadd.f32 %v558_v41, %v508_v13  ;;  %v623_v43 = vpop.permute.xlu1 %622  ;;  %v3327_v7 = vld [vmem:[#allocation51_spill] sm:$0xff] }
  0xfd   : > { %v546_v1 = vmul.f32 %v2106_v4, %v523_v45  ;;  %v553_v11 = vmul.f32 %v2109_v5, %v523_v45  ;;  %v2577_v12 = vadd.f32 %v559_v37, %v509_v29  ;;  %v535_v60 = vadd.f32 %v532_v58, %v482_v24 }
  0xfe   : > { %v560_v19 = vmul.f32 %v2112_v6, %v523_v45  ;;  %v567_v63 = vmul.f32 %v2120_v8, %v523_v45  ;;  %v568_v54 = vadd.f32 %v565_v30, %v515_v50  ;;  %v569_v2 = vadd.f32 %v566_v23, %v516_v36  ;;  %v3323_v36 = vld [vmem:[#allocation45_spill] sm:$0xff]  ;;  %v3330_v30 = vld [vmem:[#allocation54_spill] sm:$0xff] }
  0xff   : > { %v542_v52 = vadd.f32 %v539_v21, %v489_v20  ;;  %v549_v48 = vadd.f32 %v546_v1, %v496_v32  ;;  %v556_v56 = vadd.f32 %v553_v11, %v503_v61  ;;  %v630_v0 = vmul.f32 %v2140_v14, %v619_v55  ;;  %v3320_v20 = vld [vmem:[#allocation47_spill] sm:$0xff]  ;;  %v3321_v61 = vld [vmem:[#allocation44_spill] sm:$0xff] }
 0x100   : > { %v637_v13 = vmul.f32 %v2148_v16, %v619_v55  ;;  %v644_v4 = vmul.f32 %v2151_v17, %v619_v55  ;;  %v563_v5 = vadd.f32 %v560_v19, %v510_v25  ;;  %v570_v38 = vadd.f32 %v567_v63, %v517_v40  ;;  %v3325_v25 = vld [vmem:[#allocation46_spill] sm:$0xff] }
 0x101   : > { %v651_v24 = vmul.f32 %v2154_v18, %v619_v55  ;;  %v658_v6 = vmul.f32 %v2183_v26, %v619_v55  ;;  %v665_v8 = vmul.f32 %v2186_v27, %v619_v55  ;;  %v580_v50 = vadd.f32 %v2123_v9, %v533_v49  ;;  %v3328_v49 = vld [vmem:[#allocation52_spill] sm:$0xff] }
 0x102   : > { %v582_v32 = vadd.f32 %v3320_v20, %v535_v60  ;;  %v587_v57 = vadd.f32 %v3321_v61, %v540_v28  ;;  %v589_v29 = vadd.f32 %v3322_v59, %v542_v52  ;;  %v594_v35 = vadd.f32 %v3323_v36, %v547_v62  ;;  %v3329_v28 = vld [vmem:[#allocation53_spill] sm:$0xff]  ;;  %v3335_v59 = vld [vmem:[#allocation58_spill] sm:$0xff] }
 0x103   : > { %v596_v31 = vadd.f32 %v3324_v51, %v549_v48  ;;  %v601_v40 = vadd.f32 %v3325_v25, %v554_v10  ;;  %v603_v47 = vadd.f32 %v3326_v34, %v556_v56  ;;  %v608_v45 = vadd.f32 %v3327_v7, %v561_v53  ;;  %v674_v53 = vpop.permute.xlu1 %673 }
 0x104   : > { %v632_v55 = vmul.f32 %v2140_v14, %v623_v43  ;;  %v639_v9 = vmul.f32 %v2148_v16, %v623_v43  ;;  %v610_v46 = vadd.f32 %v3328_v49, %v563_v5  ;;  %v615_v41 = vadd.f32 %v3329_v28, %v568_v54  ;;  %v3342_v49 = vld [vmem:[#allocation62_spill] sm:$0xff] }
 0x105   : > { %v646_v37 = vmul.f32 %v2151_v17, %v623_v43  ;;  %v653_v62 = vmul.f32 %v2154_v18, %v623_v43  ;;  %v617_v23 = vadd.f32 %v3330_v30, %v570_v38  ;;  %v633_v58 = vadd.f32 %v630_v0, %v580_v50  ;;  %v3332_v38 = vld [vmem:[#allocation56_spill] sm:$0xff] }
 0x106   : > { %v640_v10 = vadd.f32 %v637_v13, %v587_v57  ;;  %v660_v21 = vmul.f32 %v2183_v26, %v623_v43  ;;  %v2604_v1 = vadd.f32 %v632_v55, %v582_v32  ;;  %v2606_v11 = vadd.f32 %v639_v9, %v589_v29  ;;  %v3331_v13 = vld [vmem:[#allocation55_spill] sm:$0xff] }
 0x107   : > { %v647_v60 = vadd.f32 %v644_v4, %v594_v35  ;;  %v667_v19 = vmul.f32 %v2186_v27, %v623_v43  ;;  %v2609_v63 = vadd.f32 %v646_v37, %v596_v31  ;;  %v654_v54 = vadd.f32 %v651_v24, %v601_v40  ;;  %v3333_v4 = vld [vmem:[#allocation57_spill] sm:$0xff]  ;;  %v725_v31 = vpop.permute.xlu1 %724 }
 0x108   : > { %v2611_v52 = vadd.f32 %v653_v62, %v603_v47  ;;  %v661_v48 = vadd.f32 %v658_v6, %v608_v45  ;;  %v2613_v56 = vadd.f32 %v660_v21, %v610_v46  ;;  %v668_v0 = vadd.f32 %v665_v8, %v615_v41  ;;  %v672_v6 = vpop.permute.xlu0 %671 }
 0x109   : > { %v575_v5 = vadd.f32 %v3331_v13, %v2551_v15  ;;  %v581_v50 = vadd.f32 %v3332_v38, %v2558_v33  ;;  %v2619_v20 = vadd.f32 %v667_v19, %v617_v23  ;;  %v588_v43 = vadd.f32 %v3333_v4, %v2561_v39  ;;  %v3336_v39 = vld [vmem:[#allocation59_spill] sm:$0xff]  ;;  %v3346_v13 = vld [vmem:[#allocation66_spill] sm:$0xff] }
 0x10a   : > { %v3334_v32 = vstv %s3317_s9  ;;  %v631_v61 = vmul.f32 %v2140_v14, %v621_v42  ;;  %v638_v57 = vmul.f32 %v2148_v16, %v621_v42  ;;  %v645_v8 = vmul.f32 %v2151_v17, %v621_v42  ;;  %v3338_v16 = vld [vmem:[#allocation60_spill] sm:$0xff]  ;;  %v3339_v17 = vld [vmem:[#allocation61_spill] sm:$0xff] }
 0x10b   : > { %v626_v24 = vmul.f32 %v3334_v32, %v621_v42  ;;  %v652_v15 = vmul.f32 %v2154_v18, %v621_v42  ;;  %v659_v33 = vmul.f32 %v2183_v26, %v621_v42  ;;  %v595_v29 = vadd.f32 %v3335_v59, %v2570_v22 }
 0x10c   : > { %v602_v36 = vadd.f32 %v3336_v39, %v2573_v44  ;;  %v666_v35 = vmul.f32 %v2186_v27, %v621_v42  ;;  %v3337_v14 = vstv %s3216_s26  ;;  %v609_v25 = vadd.f32 %v3338_v16, %v2577_v12  ;;  %v3343_v42 = vld [vmem:[#allocation63_spill] sm:$0xff]  ;;  %v3344_v12 = vld [vmem:[#allocation64_spill] sm:$0xff]  ;;  %v676_v30 = vpop.permute.xlu0 %675  ;;  %s3428_s26 = sld [smem:[#allocation19_spill]] }
 0x10d   : > { %v679_v51 = vmul.f32 %v3337_v14, %v674_v53  ;;  %v616_v40 = vadd.f32 %v3339_v17, %v569_v2  ;;  %v628_v18 = vadd.f32 %v626_v24, %v575_v5  ;;  %v634_v34 = vadd.f32 %v631_v61, %v581_v50  ;;  %v3345_v2 = vld [vmem:[#allocation65_spill] sm:$0xff]  ;;  %v3347_v61 = vld [vmem:[#allocation67_spill] sm:$0xff] }
 0x10e   : > { %v641_v47 = vadd.f32 %v638_v57, %v588_v43  ;;  %v648_v26 = vadd.f32 %v645_v8, %v595_v29  ;;  %v655_v7 = vadd.f32 %v652_v15, %v602_v36  ;;  %v3340_v45 = vmov %v3337_v14 }
 0x10f   : > { %v678_v22 = vmul.f32 %v3340_v45, %v672_v6  ;;  %v662_v55 = vadd.f32 %v659_v33, %v609_v25  ;;  %v3341_v9 = vstv %s2024_s18  ;;  %v683_v27 = vmul.f32 %v3342_v49, %v672_v6 }
 0x110   : > { %v731_v44 = vmul.f32 %v3341_v9, %v725_v31  ;;  %v690_v46 = vmul.f32 %v3343_v42, %v672_v6  ;;  %v669_v28 = vadd.f32 %v666_v35, %v616_v40  ;;  %v2646_v41 = vadd.f32 %v679_v51, %v628_v18  ;;  %v3351_v9 = vld [vmem:[#allocation71_spill] sm:$0xff] }
 0x111   : > { %v697_v37 = vmul.f32 %v3344_v12, %v672_v6  ;;  %v704_v62 = vmul.f32 %v3345_v2, %v672_v6  ;;  %v680_v23 = vadd.f32 %v678_v22, %v2568_v3  ;;  %v684_v21 = vmul.f32 %v3342_v49, %v674_v53 }
 0x112   : > { %v691_v19 = vmul.f32 %v3343_v42, %v674_v53  ;;  %v711_v5 = vmul.f32 %v3346_v13, %v672_v6  ;;  %v686_v38 = vadd.f32 %v683_v27, %v633_v58  ;;  %v693_v50 = vadd.f32 %v690_v46, %v640_v10  ;;  %v729_v58 = vpop.permute.xlu1 %728  ;;  %v3353_v46 = vld [vmem:[#allocation73_spill] sm:$0xff]  ;;  %p3430_p2 = scmp.ne.s32.totalorder %s3428_s26, 0 }
 0x113   : > { %v698_v4 = vmul.f32 %v3344_v12, %v674_v53  ;;  %v705_v43 = vmul.f32 %v3345_v2, %v674_v53  ;;  %v2656_v32 = vadd.f32 %v731_v44, %v680_v23  ;;  %v700_v24 = vadd.f32 %v697_v37, %v647_v60 }
 0x114   : > { %v718_v57 = vmul.f32 %v3347_v61, %v672_v6  ;;  %v685_v8 = vmul.f32 %v3342_v49, %v676_v30  ;;  %v707_v3 = vadd.f32 %v704_v62, %v654_v54  ;;  %v712_v15 = vmul.f32 %v3346_v13, %v674_v53 }
 0x115   : > { %v692_v33 = vmul.f32 %v3343_v42, %v676_v30  ;;  %v699_v59 = vmul.f32 %v3344_v12, %v676_v30  ;;  %v714_v10 = vadd.f32 %v711_v5, %v661_v48  ;;  %v719_v29 = vmul.f32 %v3347_v61, %v674_v53  ;;  %v3348_v48 = vld [vmem:[#allocation68_spill] sm:$0xff]  ;;  %v3349_v53 = vld [vmem:[#allocation69_spill] sm:$0xff] }
 0x116   : > { %v687_v39 = vadd.f32 %v684_v21, %v634_v34  ;;  %v706_v36 = vmul.f32 %v3345_v2, %v676_v30  ;;  %v721_v35 = vadd.f32 %v718_v57, %v668_v0  ;;  %v688_v60 = vadd.f32 %v685_v8, %v2604_v1  ;;  %v3350_v34 = vld [vmem:[#allocation70_spill] sm:$0xff]  ;;  %v727_v0 = vpop.permute.xlu0 %726  ;;  %v785_v27 = vpop.permute.xlu1 %784 }
 0x117   : > { %v694_v6 = vadd.f32 %v691_v19, %v641_v47  ;;  %v713_v14 = vmul.f32 %v3346_v13, %v676_v30  ;;  %v695_v54 = vadd.f32 %v692_v33, %v2606_v11  ;;  %v701_v51 = vadd.f32 %v698_v4, %v648_v26  ;;  %v3352_v26 = vld [vmem:[#allocation72_spill] sm:$0xff] }
 0x118   : > { %v702_v16 = vadd.f32 %v699_v59, %v2609_v63  ;;  %v720_v25 = vmul.f32 %v3347_v61, %v676_v30  ;;  %v708_v17 = vadd.f32 %v705_v43, %v655_v7  ;;  %v736_v40 = vmul.f32 %v3348_v48, %v725_v31 }
 0x119   : > { %v743_v18 = vmul.f32 %v3349_v53, %v725_v31  ;;  %v750_v45 = vmul.f32 %v3350_v34, %v725_v31  ;;  %v709_v1 = vadd.f32 %v706_v36, %v2611_v52  ;;  %v715_v47 = vadd.f32 %v712_v15, %v662_v55 }
 0x11a   : > { %v722_v22 = vadd.f32 %v719_v29, %v669_v28  ;;  %v757_v44 = vmul.f32 %v3351_v9, %v725_v31  ;;  %v716_v11 = vadd.f32 %v713_v14, %v2613_v56  ;;  %v764_v63 = vmul.f32 %v3352_v26, %v725_v31  ;;  %v836_v15 = vpop.permute.xlu1 %835 }
 0x11b   : > { %v738_v49 = vmul.f32 %v3348_v48, %v729_v58  ;;  %v745_v7 = vmul.f32 %v3349_v53, %v729_v58  ;;  %v723_v42 = vadd.f32 %v720_v25, %v2619_v20  ;;  %v771_v12 = vmul.f32 %v3353_v46, %v725_v31 }
 0x11c   : > { %v739_v37 = vadd.f32 %v736_v40, %v686_v38  ;;  %v752_v52 = vmul.f32 %v3350_v34, %v729_v58  ;;  %v746_v55 = vadd.f32 %v743_v18, %v693_v50  ;;  %v753_v28 = vadd.f32 %v750_v45, %v700_v24  ;;  %v783_v38 = vpop.permute.xlu0 %782 }
 0x11d   : > { %v759_v2 = vmul.f32 %v3351_v9, %v729_v58  ;;  %v766_v56 = vmul.f32 %v3352_v26, %v729_v58  ;;  %v741_v62 = vadd.f32 %v738_v49, %v688_v60  ;;  %v748_v30 = vadd.f32 %v745_v7, %v695_v54 }
 0x11e   : > { %v760_v23 = vadd.f32 %v757_v44, %v707_v3  ;;  %v773_v21 = vmul.f32 %v3353_v46, %v729_v58  ;;  %v767_v19 = vadd.f32 %v764_v63, %v714_v10  ;;  %v3354_v13 = vstv %s2024_s18  ;;  %v3361_v44 = vld [vmem:[#allocation77_spill] sm:$0xff]  ;;  %s408_s18 = sld [smem:[#allocation3]] }
 0x11f   : > { %v732_v5 = vmul.f32 %v3354_v13, %v727_v0  ;;  %v737_v20 = vmul.f32 %v3348_v48, %v727_v0  ;;  %v744_v31 = vmul.f32 %v3349_v53, %v727_v0  ;;  %v755_v50 = vadd.f32 %v752_v52, %v702_v16  ;;  %v3357_v16 = vld [vmem:[#allocation74_spill] sm:$0xff] }
 0x120   : > { %v751_v4 = vmul.f32 %v3350_v34, %v727_v0  ;;  %v758_v43 = vmul.f32 %v3351_v9, %v727_v0  ;;  %v765_v24 = vmul.f32 %v3352_v26, %v727_v0  ;;  %v762_v61 = vadd.f32 %v759_v2, %v709_v1  ;;  %v787_v9 = vpop.permute.xlu0 %786 }
 0x121   : > { %v769_v57 = vadd.f32 %v766_v56, %v716_v11  ;;  %v774_v8 = vadd.f32 %v771_v12, %v721_v35  ;;  %v772_v3 = vmul.f32 %v3353_v46, %v727_v0  ;;  %v776_v33 = vadd.f32 %v773_v21, %v723_v42  ;;  %v3359_v35 = vld [vmem:[#allocation75_spill] sm:$0xff] }
 0x122   : > { %v734_v59 = vadd.f32 %v732_v5, %v2646_v41  ;;  %v740_v58 = vadd.f32 %v737_v20, %v687_v39  ;;  %v3355_v10 = vstv %s3234_s14  ;;  %v747_v36 = vadd.f32 %v744_v31, %v694_v6  ;;  %v3360_v39 = vld [vmem:[#allocation76_spill] sm:$0xff]  ;;  %v840_v20 = vpop.permute.xlu1 %839 }
 0x123   : > { %v790_v29 = vmul.f32 %v3355_v10, %v785_v27  ;;  %v754_v60 = vadd.f32 %v751_v4, %v701_v51  ;;  %v3356_v14 = vmov %v3355_v10  ;;  %v794_v25 = vmul.f32 %v3357_v16, %v783_v38 }
 0x124   : > { %v789_v54 = vmul.f32 %v3356_v14, %v783_v38  ;;  %v761_v48 = vadd.f32 %v758_v43, %v708_v17  ;;  %v768_v40 = vadd.f32 %v765_v24, %v715_v47  ;;  %v3358_v53 = vstv %s2114_s30  ;;  %v3362_v17 = vld [vmem:[#allocation78_spill] sm:$0xff] }
 0x125   : > { %v842_v18 = vmul.f32 %v3358_v53, %v836_v15  ;;  %v801_v34 = vmul.f32 %v3359_v35, %v783_v38  ;;  %v775_v45 = vadd.f32 %v772_v3, %v722_v22  ;;  %v2702_v0 = vadd.f32 %v790_v29, %v734_v59  ;;  %v3363_v22 = vld [vmem:[#allocation79_spill] sm:$0xff]  ;;  %v3364_v59 = vld [vmem:[#allocation80_spill] sm:$0xff]  ;;  %v3366_v29 = vld [vmem:[#allocation82_spill] sm:$0xff] }
 0x126   : > { %v795_v41 = vmul.f32 %v3357_v16, %v785_v27  ;;  %v808_v1 = vmul.f32 %v3360_v39, %v783_v38  ;;  %v791_v6 = vadd.f32 %v789_v54, %v2656_v32  ;;  %v802_v51 = vmul.f32 %v3359_v35, %v785_v27  ;;  %v838_v54 = vpop.permute.xlu0 %837 }
 0x127   : > { %v815_v11 = vmul.f32 %v3361_v44, %v783_v38  ;;  %v822_v47 = vmul.f32 %v3362_v17, %v783_v38  ;;  %v797_v26 = vadd.f32 %v794_v25, %v739_v37  ;;  %v804_v63 = vadd.f32 %v801_v34, %v746_v55 }
 0x128   : > { %v809_v49 = vmul.f32 %v3360_v39, %v785_v27  ;;  %v829_v7 = vmul.f32 %v3363_v22, %v783_v38  ;;  %v2712_v42 = vadd.f32 %v842_v18, %v791_v6  ;;  %v811_v46 = vadd.f32 %v808_v1, %v753_v28  ;;  %v3368_v18 = vld [vmem:[#allocation84_spill] sm:$0xff]  ;;  %v891_v1 = vpop.permute.xlu1 %890 }
 0x129   : > { %v816_v12 = vmul.f32 %v3361_v44, %v785_v27  ;;  %v796_v52 = vmul.f32 %v3357_v16, %v787_v9  ;;  %v818_v32 = vadd.f32 %v815_v11, %v760_v23  ;;  %v823_v2 = vmul.f32 %v3362_v17, %v785_v27 }
 0x12a   : > { %v825_v56 = vadd.f32 %v822_v47, %v767_v19  ;;  %v803_v21 = vmul.f32 %v3359_v35, %v787_v9  ;;  %v830_v37 = vmul.f32 %v3363_v22, %v785_v27  ;;  %v832_v55 = vadd.f32 %v829_v7, %v774_v8  ;;  %v3365_v27 = vld [vmem:[#allocation81_spill] sm:$0xff] }
 0x12b   : > { %v810_v13 = vmul.f32 %v3360_v39, %v787_v9  ;;  %v817_v5 = vmul.f32 %v3361_v44, %v787_v9  ;;  %v798_v31 = vadd.f32 %v795_v41, %v740_v58  ;;  %v799_v28 = vadd.f32 %v796_v52, %v741_v62  ;;  %v3367_v62 = vld [vmem:[#allocation83_spill] sm:$0xff]  ;;  %v3369_v35 = vld [vmem:[#allocation85_spill] sm:$0xff] }
 0x12c   : > { %v805_v38 = vadd.f32 %v802_v51, %v747_v36  ;;  %v824_v4 = vmul.f32 %v3362_v17, %v787_v9  ;;  %v806_v43 = vadd.f32 %v803_v21, %v748_v30  ;;  %v812_v23 = vadd.f32 %v809_v49, %v754_v60 }
 0x12d   : > { %v819_v24 = vadd.f32 %v816_v12, %v761_v48  ;;  %v831_v19 = vmul.f32 %v3363_v22, %v787_v9  ;;  %v826_v3 = vadd.f32 %v823_v2, %v768_v40  ;;  %v847_v10 = vmul.f32 %v3364_v59, %v836_v15 }
 0x12e   : > { %v854_v8 = vmul.f32 %v3365_v27, %v836_v15  ;;  %v861_v14 = vmul.f32 %v3366_v29, %v836_v15  ;;  %v813_v16 = vadd.f32 %v810_v13, %v755_v50  ;;  %v820_v25 = vadd.f32 %v817_v5, %v762_v61  ;;  %v989_v5 = vpop.permute.xlu1 %988 }
 0x12f   : > { %v833_v58 = vadd.f32 %v830_v37, %v775_v45  ;;  %v868_v36 = vmul.f32 %v3367_v62, %v836_v15  ;;  %v827_v53 = vadd.f32 %v824_v4, %v769_v57  ;;  %v875_v30 = vmul.f32 %v3368_v18, %v836_v15 }
 0x130   : > { %v849_v60 = vmul.f32 %v3364_v59, %v840_v20  ;;  %v856_v48 = vmul.f32 %v3365_v27, %v840_v20  ;;  %v834_v40 = vadd.f32 %v831_v19, %v776_v33  ;;  %v882_v34 = vmul.f32 %v3369_v35, %v836_v15  ;;  %v3373_v19 = vld [vmem:[#allocation86_spill] sm:$0xff] }
 0x131   : > { %v850_v41 = vadd.f32 %v847_v10, %v797_v26  ;;  %v863_v39 = vmul.f32 %v3366_v29, %v840_v20  ;;  %v857_v50 = vadd.f32 %v854_v8, %v804_v63  ;;  %v864_v61 = vadd.f32 %v861_v14, %v811_v46  ;;  %v889_v26 = vpop.permute.xlu0 %888 }
 0x132   : > { %v870_v45 = vmul.f32 %v3367_v62, %v840_v20  ;;  %v877_v57 = vmul.f32 %v3368_v18, %v840_v20  ;;  %v852_v9 = vadd.f32 %v849_v60, %v799_v28  ;;  %v859_v6 = vadd.f32 %v856_v48, %v806_v43  ;;  %v3380_v48 = vld [vmem:[#allocation92_spill] sm:$0xff] }
 0x133   : > { %v871_v51 = vadd.f32 %v868_v36, %v818_v32  ;;  %v884_v44 = vmul.f32 %v3369_v35, %v840_v20  ;;  %v878_v11 = vadd.f32 %v875_v30, %v825_v56  ;;  %v3370_v17 = vstv %s2114_s30  ;;  %v3377_v36 = vld [vmem:[#allocation90_spill] sm:$0xff]  ;;  %s3426_s30 = sld [smem:[#allocation23_spill]] }
 0x134   : > { %v843_v33 = vmul.f32 %v3370_v17, %v838_v54  ;;  %v848_v15 = vmul.f32 %v3364_v59, %v838_v54  ;;  %v855_v47 = vmul.f32 %v3365_v27, %v838_v54  ;;  %v866_v63 = vadd.f32 %v863_v39, %v813_v16  ;;  %v3376_v16 = vld [vmem:[#allocation89_spill] sm:$0xff] }
 0x135   : > { %v862_v49 = vmul.f32 %v3366_v29, %v838_v54  ;;  %v869_v22 = vmul.f32 %v3367_v62, %v838_v54  ;;  %v876_v7 = vmul.f32 %v3368_v18, %v838_v54  ;;  %v873_v46 = vadd.f32 %v870_v45, %v820_v25  ;;  %v893_v62 = vpop.permute.xlu0 %892 }
 0x136   : > { %v880_v12 = vadd.f32 %v877_v57, %v827_v53  ;;  %v885_v52 = vadd.f32 %v882_v34, %v832_v55  ;;  %v883_v32 = vmul.f32 %v3369_v35, %v838_v54  ;;  %v887_v2 = vadd.f32 %v884_v44, %v834_v40  ;;  %v3374_v55 = vld [vmem:[#allocation88_spill] sm:$0xff] }
 0x137   : > { %v845_v56 = vadd.f32 %v843_v33, %v2702_v0  ;;  %v851_v21 = vadd.f32 %v848_v15, %v798_v31  ;;  %v3371_v37 = vstv %s2158_s2  ;;  %v858_v20 = vadd.f32 %v855_v47, %v805_v38  ;;  %s3427_s2 = sld [smem:[#allocation16_spill]] }
 0x138   : > { %v896_v13 = vmul.f32 %v3371_v37, %v891_v1  ;;  %v865_v28 = vadd.f32 %v862_v49, %v812_v23  ;;  %v3372_v4 = vmov %v3371_v37  ;;  %v900_v59 = vmul.f32 %v3373_v19, %v889_v26 }
 0x139   : > { %v895_v43 = vmul.f32 %v3372_v4, %v889_v26  ;;  %v872_v10 = vadd.f32 %v869_v22, %v819_v24  ;;  %v879_v27 = vadd.f32 %v876_v7, %v826_v3  ;;  %v886_v8 = vadd.f32 %v883_v32, %v833_v58  ;;  %v3378_v24 = vld [vmem:[#allocation91_spill] sm:$0xff]  ;;  %s1333_s14 = sshll.u32 %s3426_s30, 4  ;;  %s1212_s25 = scalar_lea.sflag [#allocation6], %s3426_s30 }
 0x13a   : > { %v907_v29 = vmul.f32 %v3374_v55, %v889_v26  ;;  %v2750_v14 = vadd.f32 %v896_v13, %v845_v56  ;;  %v3375_v0 = vstv %s2250_s28  ;;  %v914_v25 = vmul.f32 %v3376_v16, %v889_v26  ;;  %v3379_v58 = vld [vmem:[#allocation87_spill] sm:$0xff]  ;;  %s220_s5 = scalar_lea.vmem [#allocation9], %s1333_s14 }
 0x13b   : > { %v897_v54 = vadd.f32 %v895_v43, %v2712_v42  ;;  %v995_v31 = vmul.f32 %v3375_v0, %v989_v5  ;;  %v901_v38 = vmul.f32 %v3373_v19, %v891_v1  ;;  %v908_v23 = vmul.f32 %v3374_v55, %v891_v1  ;;  %v3386_v0 = vld [vmem:[#allocation110_spill] sm:$0xff]  ;;  %s1225_s13 = sshll.u32 %s220_s5, 4  ;;  %s3015_s13 = int_to_ptr.vmem [resolvable:$true] %s1225_s13 }
 0x13c   : > { %v921_v53 = vmul.f32 %v3377_v36, %v889_v26  ;;  %v928_v3 = vmul.f32 %v3378_v24, %v889_v26  ;;  %v903_v30 = vadd.f32 %v900_v59, %v850_v41  ;;  %v915_v60 = vmul.f32 %v3376_v16, %v891_v1  ;;  %v3383_v59 = vld [vmem:[#allocation103_spill] sm:$0xff]  ;;  %s1584_s4 = scalar_lea.vmem %s3015_s13, 256  ;;  %p1591_p0 = scmp.lt.s32.totalorder %s3015_s13, %s1589_s1 }
 0x13d   : > { %v944_v18 = vadd.f32 %v3379_v58, %v897_v54  ;;  %v935_v42 = vmul.f32 %v3380_v48, %v889_v26  ;;  %v910_v40 = vadd.f32 %v907_v29, %v857_v50  ;;  %v917_v35 = vadd.f32 %v914_v25, %v864_v61  ;;  %v3384_v29 = vld [vmem:[#allocation106_spill] sm:$0xff]  ;;  %v3390_v25 = vld [vmem:[#allocation100_spill] sm:$0xff]  ;;  %p1585_p12 = scmp.ne.s32.totalorder %s3015_s13, %s1584_s4  ;;  %p1592_p1 = scmp.lt.s32.totalorder %s1590_s10, %s1584_s4 }
 0x13e   : > { %v922_v34 = vmul.f32 %v3377_v36, %v891_v1  ;;  %v902_v39 = vmul.f32 %v3373_v19, %v893_v62  ;;  %v924_v45 = vadd.f32 %v921_v53, %v871_v51  ;;  %v929_v57 = vmul.f32 %v3378_v24, %v891_v1  ;;  %v3382_v19 = vld [vmem:[#allocation99_spill] sm:$0xff]  ;;  %v3393_v53 = vld [vmem:[#allocation96_spill] sm:$0xff] }
 0x13f   : > { %v936_v44 = vmul.f32 %v3380_v48, %v891_v1  ;;  %v909_v17 = vmul.f32 %v3374_v55, %v893_v62  ;;  %v2768_v33 = vadd.f32 %v995_v31, %v944_v18  ;;  %v931_v41 = vadd.f32 %v928_v3, %v878_v11  ;;  %v3394_v3 = vld [vmem:[#allocation102_spill] sm:$0xff]  ;;  %v3395_v18 = vld [vmem:[#allocation104_spill] sm:$0xff]  ;;  %p1586_p13 = pnand %p1585_p12, %p3430_p2  ;;  %p1593_p9 = por %p1592_p1, %p1591_p0 }
 0x140   : > { %v938_v15 = vadd.f32 %v935_v42, %v885_v52  ;;  %v916_v47 = vmul.f32 %v3376_v16, %v893_v62  ;;  %v904_v26 = vadd.f32 %v901_v38, %v851_v21  ;;  %v905_v50 = vadd.f32 %v902_v39, %v852_v9  ;;  %v3381_v52 = vld [vmem:[#allocation98_spill] sm:$0xff]  ;;  %v991_v16 = vpop.permute.xlu0 %990  ;;  %v3391_v38 = vld [vmem:[#allocation95_spill] sm:$0xff] }
 0x141   : > { %v923_v61 = vmul.f32 %v3377_v36, %v893_v62  ;;  %v930_v49 = vmul.f32 %v3378_v24, %v893_v62  ;;  %v911_v22 = vadd.f32 %v908_v23, %v858_v20  ;;  %v912_v51 = vadd.f32 %v909_v17, %v859_v6  ;;  %v3385_v20 = vld [vmem:[#allocation107_spill] sm:$0xff]  ;;  %v3392_v23 = vld [vmem:[#allocation101_spill] sm:$0xff]  ;;  %p1587_p6 = pneg %p1586_p13 }
 0x142   : > { %v918_v7 = vadd.f32 %v915_v60, %v865_v28  ;;  %v937_v32 = vmul.f32 %v3380_v48, %v893_v62  ;;  %v919_v1 = vadd.f32 %v916_v47, %v866_v63  ;;  %v925_v56 = vadd.f32 %v922_v34, %v872_v10  ;;  %v993_v28 = vpop.permute.xlu1 %992  ;;  %v3387_v63 = vld [vmem:[#allocation93_spill] sm:$0xff] }
 0x143   : > { %v932_v37 = vadd.f32 %v929_v57, %v879_v27  ;;  %v939_v13 = vadd.f32 %v936_v44, %v886_v8  ;;  %v926_v4 = vadd.f32 %v923_v61, %v873_v46  ;;  %v933_v11 = vadd.f32 %v930_v49, %v880_v12  ;;  %v3388_v27 = vld [vmem:[#allocation97_spill] sm:$0xff]  ;;  %v3389_v46 = vld [vmem:[#allocation94_spill] sm:$0xff]  ;;  %p1594_p8 = pnand %p1593_p9, %p1587_p6 }
 0x144   : > { %v1000_v43 = vmul.f32 %v3381_v52, %v989_v5  ;;  %v1007_v21 = vmul.f32 %v3382_v19, %v989_v5  ;;  %v940_v9 = vadd.f32 %v937_v32, %v887_v2  ;;  %v1014_v55 = vmul.f32 %v3383_v59, %v989_v5  ;;  %v3396_v48 = vld [vmem:[#allocation105_spill] sm:$0xff] }
 0x145   : > { %v1021_v54 = vmul.f32 %v3384_v29, %v989_v5  ;;  %v1028_v6 = vmul.f32 %v3385_v20, %v989_v5  ;;  %v1035_v31 = vmul.f32 %v3386_v0, %v989_v5  ;;  %v950_v10 = vadd.f32 %v3387_v63, %v903_v30  ;;  %v3398_v57 = vld [vmem:[#allocation109_spill] sm:$0xff] }
 0x146   : > { %v952_v8 = vadd.f32 %v3388_v27, %v905_v50  ;;  %v957_v12 = vadd.f32 %v3389_v46, %v910_v40  ;;  %v959_v62 = vadd.f32 %v3390_v25, %v912_v51  ;;  %v964_v2 = vadd.f32 %v3391_v38, %v917_v35  ;;  %v3397_v40 = vld [vmem:[#allocation108_spill] sm:$0xff]  ;;  %v3401_v27 = vld [vmem:[#allocation113_spill] sm:$0xff]  ;;  %v3404_v38 = vld [vmem:[#allocation115_spill] sm:$0xff] }
 0x147   : > { %v966_v36 = vadd.f32 %v3392_v23, %v919_v1  ;;  %v971_v24 = vadd.f32 %v3393_v53, %v924_v45  ;;  %v973_v58 = vadd.f32 %v3394_v3, %v926_v4  ;;  %v978_v60 = vadd.f32 %v3395_v18, %v931_v41  ;;  %v2816_v4 = vpop.permute.xlu1 %1043  ;;  %v3405_v23 = vld [vmem:[#allocation116_spill] sm:$0xff]  ;;  %v3406_v53 = vld [vmem:[#allocation117_spill] sm:$0xff]  ;;  %v3409_v18 = vld [vmem:[#allocation118_spill] sm:$0xff] }
 0x148   : > { %v1002_v5 = vmul.f32 %v3381_v52, %v993_v28  ;;  %v1009_v30 = vmul.f32 %v3382_v19, %v993_v28  ;;  %v980_v42 = vadd.f32 %v3396_v48, %v933_v11  ;;  %v985_v34 = vadd.f32 %v3397_v40, %v938_v15  ;;  %v1042_v11 = vpop.permute.xlu0 %1041  ;;  %v3411_v40 = vld [vmem:[#allocation120_spill] sm:$0xff] }
 0x149   : > { %v1016_v39 = vmul.f32 %v3383_v59, %v993_v28  ;;  %v1023_v35 = vmul.f32 %v3384_v29, %v993_v28  ;;  %v987_v44 = vadd.f32 %v3398_v57, %v940_v9  ;;  %v2796_v17 = vadd.f32 %v1000_v43, %v950_v10  ;;  %v3399_v9 = vld [vmem:[#allocation111_spill] sm:$0xff]  ;;  %v3413_v57 = vld [vmem:[#allocation121_spill] sm:$0xff] }
 0x14a   : > { %v2798_v45 = vadd.f32 %v1007_v21, %v957_v12  ;;  %v1030_v41 = vmul.f32 %v3385_v20, %v993_v28  ;;  %v2801_v47 = vadd.f32 %v1002_v5, %v952_v8  ;;  %v2803_v50 = vadd.f32 %v1009_v30, %v959_v62  ;;  %v3403_v62 = vld [vmem:[#allocation114_spill] sm:$0xff]  ;;  %v3410_v30 = vld [vmem:[#allocation119_spill] sm:$0xff] }
 0x14b   : > { %v2805_v61 = vadd.f32 %v1014_v55, %v964_v2  ;;  %v1037_v15 = vmul.f32 %v3386_v0, %v993_v28  ;;  %v2808_v49 = vadd.f32 %v1016_v39, %v966_v36  ;;  %v2810_v51 = vadd.f32 %v1021_v54, %v971_v24  ;;  %v3400_v55 = vld [vmem:[#allocation112_spill] sm:$0xff] }
 0x14c   : > { %v2812_v32 = vadd.f32 %v1023_v35, %v973_v58  ;;  %v2814_v1 = vadd.f32 %v1028_v6, %v978_v60  ;;  %v1033_v43 = vadd.f32 %v1030_v41, %v980_v42  ;;  %v1038_v21 = vadd.f32 %v1035_v31, %v985_v34  ;;  %v2853_v58 = vpop.permute.xlu1 %1094 }
 0x14d   : > { %v945_v63 = vadd.f32 %v3399_v9, %v2750_v14  ;;  %v951_v10 = vadd.f32 %v3400_v55, %v904_v26  ;;  %v2821_v28 = vadd.f32 %v1037_v15, %v987_v44  ;;  %v958_v54 = vadd.f32 %v3401_v27, %v911_v22  ;;  %v3414_v9 = vld [vmem:[#allocation122_spill] sm:$0xff]  ;;  %v3415_v55 = vld [vmem:[#allocation123_spill] sm:$0xff] }
 0x14e   : > { %v3402_v8 = vstv %s2250_s28  ;;  %v1001_v6 = vmul.f32 %v3381_v52, %v991_v16  ;;  %v1008_v12 = vmul.f32 %v3382_v19, %v991_v16  ;;  %v1015_v25 = vmul.f32 %v3383_v59, %v991_v16  ;;  %s1445_s28 = sshll.u32 %s3427_s2, 8 }
 0x14f   : > { %v996_v46 = vmul.f32 %v3402_v8, %v991_v16  ;;  %v1022_v31 = vmul.f32 %v3384_v29, %v991_v16  ;;  %v1029_v14 = vmul.f32 %v3385_v20, %v991_v16  ;;  %v965_v26 = vadd.f32 %v3403_v62, %v918_v7 }
 0x150   : > { %v972_v2 = vadd.f32 %v3404_v38, %v925_v56  ;;  %v979_v36 = vadd.f32 %v3405_v23, %v932_v37  ;;  %v1036_v22 = vmul.f32 %v3386_v0, %v991_v16  ;;  %v986_v24 = vadd.f32 %v3406_v53, %v939_v13  ;;  %v1046_v0 = vpop.permute.xlu0 %1045  ;;  %v3420_v38 = vld [vmem:[#allocation128_spill] sm:$0xff]  ;;  %v1099_v23 = vpop.permute.xlu1 %1098 }
 0x151   : > { %v2836_v52 = vadd.f32 %v996_v46, %v945_v63  ;;  %v2838_v3 = vadd.f32 %v1001_v6, %v951_v10  ;;  %v3407_v19 = vstv %s2322_s6  ;;  %v2845_v29 = vadd.f32 %v1008_v12, %v958_v54  ;;  %v3416_v6 = vld [vmem:[#allocation124_spill] sm:$0xff]  ;;  %s3429_s6 = sld [smem:[#allocation132_spill]] }
 0x152   : > { %v2843_v59 = vmul.f32 %v3407_v19, %v2816_v4  ;;  %v2847_v20 = vadd.f32 %v1015_v25, %v965_v26  ;;  %v2849_v7 = vadd.f32 %v1022_v31, %v972_v2  ;;  %v3408_v56 = vmov %v3407_v19  ;;  %v3417_v25 = vld [vmem:[#allocation125_spill] sm:$0xff] }
 0x153   : > { %v1048_v37 = vmul.f32 %v3408_v56, %v1042_v11  ;;  %v2855_v13 = vadd.f32 %v1029_v14, %v979_v36  ;;  %v2857_v16 = vadd.f32 %v1036_v22, %v986_v24  ;;  %v1053_v60 = vmul.f32 %v3409_v18, %v1042_v11  ;;  %v3418_v14 = vld [vmem:[#allocation126_spill] sm:$0xff]  ;;  %v3421_v36 = vld [vmem:[#allocation129_spill] sm:$0xff] }
 0x154   : > { %v2862_v5 = vmul.f32 %v3409_v18, %v2816_v4  ;;  %v1060_v48 = vmul.f32 %v3410_v30, %v1042_v11  ;;  %v2867_v42 = vmul.f32 %v3410_v30, %v2816_v4  ;;  %v1067_v34 = vmul.f32 %v3411_v40, %v1042_v11 }
 0x155   : > { %v2872_v39 = vmul.f32 %v3411_v40, %v2816_v4  ;;  %v2875_v35 = vadd.f32 %v1048_v37, %v2768_v33  ;;  %v1074_v44 = vmul.f32 %v3413_v57, %v1042_v11  ;;  %v2880_v41 = vmul.f32 %v3413_v57, %v2816_v4 }
 0x156   : > { %v1055_v15 = vmul.f32 %v3409_v18, %v1046_v0  ;;  %v1081_v63 = vmul.f32 %v3414_v9, %v1042_v11  ;;  %v1088_v10 = vmul.f32 %v3415_v55, %v1042_v11  ;;  %v1062_v27 = vmul.f32 %v3410_v30, %v1046_v0  ;;  %v3419_v11 = vld [vmem:[#allocation127_spill] sm:$0xff] }
 0x157   : > { %3412 = vst [vmem:[#allocation47_spill] sm:$0xff] %v2875_v35  ;;  %v1069_v54 = vmul.f32 %v3411_v40, %v1046_v0  ;;  %v1076_v8 = vmul.f32 %v3413_v57, %v1046_v0  ;;  %v1083_v33 = vmul.f32 %v3414_v9, %v1046_v0  ;;  %v1090_v46 = vmul.f32 %v3415_v55, %v1046_v0  ;;  %s3013_s24 = scalar_lea.hbm %s3429_s6, %s1445_s28 }
 0x158   : > { %v1106_v12 = vmul.f32 %v3416_v6, %v2853_v58  ;;  %v1113_v31 = vmul.f32 %v3417_v25, %v2853_v58  ;;  %v1120_v62 = vmul.f32 %v3418_v14, %v2853_v58  ;;  %v1127_v26 = vmul.f32 %v3419_v11, %v2853_v58 }
 0x159   : > { %v1134_v2 = vmul.f32 %v3420_v38, %v2853_v58  ;;  %v1141_v22 = vmul.f32 %v3421_v36, %v2853_v58  ;;  %v1056_v53 = vadd.f32 %v1053_v60, %v2796_v17  ;;  %v1058_v24 = vadd.f32 %v1055_v15, %v2801_v47 }
 0x15a   : > { %v1063_v19 = vadd.f32 %v1060_v48, %v2798_v45  ;;  %v1065_v56 = vadd.f32 %v1062_v27, %v2803_v50  ;;  %v1070_v37 = vadd.f32 %v1067_v34, %v2805_v61  ;;  %v1072_v0 = vadd.f32 %v1069_v54, %v2808_v49  ;;  %v3422_v54 = vld [vmem:[#allocation24_spill] sm:$0xff] }
 0x15b   : > { %v1077_v18 = vadd.f32 %v1074_v44, %v2810_v51  ;;  %v1079_v30 = vadd.f32 %v1076_v8, %v2812_v32  ;;  %v1084_v40 = vadd.f32 %v1081_v63, %v2814_v1  ;;  %v1086_v57 = vadd.f32 %v1083_v33, %v1033_v43 }
 0x15c   : > { %v1108_v35 = vmul.f32 %v3416_v6, %v1099_v23  ;;  %v1091_v17 = vadd.f32 %v1088_v10, %v1038_v21  ;;  %v2912_v60 = vadd.f32 %v1106_v12, %v1056_v53  ;;  %v1115_v45 = vmul.f32 %v3417_v25, %v1099_v23 }
 0x15d   : > { %v1122_v47 = vmul.f32 %v3418_v14, %v1099_v23  ;;  %v2918_v61 = vadd.f32 %v1113_v31, %v1063_v19  ;;  %v2920_v49 = vadd.f32 %v1120_v62, %v1070_v37  ;;  %v1129_v51 = vmul.f32 %v3419_v11, %v1099_v23 }
 0x15e   : > { %v2916_v50 = vadd.f32 %v1108_v35, %v1058_v24  ;;  %v2923_v32 = vadd.f32 %v1115_v45, %v1065_v56  ;;  %v2927_v43 = vadd.f32 %v1127_v26, %v1077_v18  ;;  %v1136_v21 = vmul.f32 %v3420_v38, %v1099_v23 }
 0x15f   : > { %v2925_v1 = vadd.f32 %v1122_v47, %v1072_v0  ;;  %v2930_v48 = vadd.f32 %v1129_v51, %v1079_v30  ;;  %v2932_v34 = vadd.f32 %v1134_v2, %v1084_v40  ;;  %v1143_v35 = vmul.f32 %v3421_v36, %v1099_v23 }
 0x160   : > { %v2935_v44 = vadd.f32 %v1141_v22, %v1091_v17  ;;  %v1082_v15 = vmul.f32 %v3414_v9, %v2816_v4  ;;  %v1089_v63 = vmul.f32 %v3415_v55, %v2816_v4  ;;  %v1093_v10 = vadd.f32 %v1090_v46, %v2821_v28  ;;  %v1097_v46 = vpop.permute.xlu0 %1096  ;;  %v3425_v17 = vld [vmem:[#allocation47_spill] sm:$0xff] }
 0x161   : > { %v2942_v27 = vadd.f32 %v1136_v21, %v1086_v57  ;;  %vm1150_vm3 = vcmp.lt.s32.totalorder %v3422_v54, 7  ;;  %v1147_v8 = vrot.slane %v2912_v60, 1  ;;  %v1149_v33 = vrot.slane %v2916_v50, 1 }
 0x162   : > { %v1155_v12 = vrot.slane %v2918_v61, 2  ;;  %v1157_v31 = vrot.slane %v2923_v32, 2  ;;  %vm1158_vm4 = vcmp.lt.s32.totalorder %v3422_v54, 6  ;;  %v1146_v9 = vadd.f32 %v1143_v35, %v1093_v10 }
 0x163   : > { %v1163_v4 = vrot.slane %v2920_v49, 3  ;;  %v1165_v28 = vrot.slane %v2925_v1, 3  ;;  %v1171_v55 = vrot.slane %v2927_v43, 4  ;;  %vm1166_vm5 = vcmp.lt.s32.totalorder %v3422_v54, 5 }
 0x164   : > { %vm1174_vm6 = vcmp.lt.s32.totalorder %v3422_v54, 4  ;;  %v1173_v62 = vrot.slane %v2930_v48, 4  ;;  %v1179_v26 = vrot.slane %v2932_v34, 5  ;;  %v1181_v2 = vrot.slane %v2942_v27, 5 }
 0x165   : > { %v1186_v23 = vrot.slane %v2935_v44, 6  ;;  %v3423_v22 = vstv %s2404_s22  ;;  %vm1189_vm7 = vcmp.lt.s32.totalorder %v3422_v54, 2  ;;  %v1057_v24 = vadd.f32 %v2862_v5, %v2838_v3 }
 0x166   : > { %v1101_v53 = vmul.f32 %v3423_v22, %v2853_v58  ;;  %v1064_v19 = vadd.f32 %v2867_v42, %v2845_v29  ;;  %v1071_v56 = vadd.f32 %v2872_v39, %v2847_v20  ;;  %v1078_v37 = vadd.f32 %v2880_v41, %v2849_v7 }
 0x167   : > { %v1085_v0 = vadd.f32 %v1082_v15, %v2855_v13  ;;  %v3424_v18 = vmov %v3423_v22  ;;  %v1107_v58 = vmul.f32 %v3416_v6, %v1097_v46  ;;  %v1114_v40 = vmul.f32 %v3417_v25, %v1097_v46 }
 0x168   : > { %v1102_v30 = vmul.f32 %v3424_v18, %v1097_v46  ;;  %v1121_v57 = vmul.f32 %v3418_v14, %v1097_v46  ;;  %v1128_v3 = vmul.f32 %v3419_v11, %v1097_v46  ;;  %v1135_v29 = vmul.f32 %v3420_v38, %v1097_v46 }
 0x169   : > { %v1051_v20 = vadd.f32 %v2843_v59, %v2836_v52  ;;  %v1092_v5 = vadd.f32 %v1089_v63, %v2857_v16  ;;  %v1110_v7 = vadd.f32 %v1107_v58, %v1057_v24  ;;  %v1142_v13 = vmul.f32 %v3421_v36, %v1097_v46 }
 0x16a   : > { %v1117_v42 = vadd.f32 %v1114_v40, %v1064_v19  ;;  %v1124_v39 = vadd.f32 %v1121_v57, %v1071_v56  ;;  %v1131_v41 = vadd.f32 %v1128_v3, %v1078_v37  ;;  %v1138_v6 = vadd.f32 %v1135_v29, %v1085_v0 }
 0x16b   : > { %v1103_v25 = vadd.f32 %v1101_v53, %v3425_v17  ;;  %v1104_v60 = vadd.f32 %v1102_v30, %v1051_v20  ;;  %v1145_v14 = vadd.f32 %v1142_v13, %v1092_v5  ;;  %v1148_v45 = vrot.slane %v1110_v7, 1 }
 0x16c   : > { %v1156_v11 = vrot.slane %v1117_v42, 2  ;;  %v1164_v47 = vrot.slane %v1124_v39, 3  ;;  %v1172_v38 = vrot.slane %v1131_v41, 4  ;;  %v1180_v50 = vrot.slane %v1138_v6, 5 }
 0x16d   : > { %v1188_v61 = vrot.slane %v1146_v9, 6  ;;  %v1151_v52 = vsel %vm1150_vm3, %v1148_v45, %v1149_v33  ;;  %v1152_v59 = vsel %vm1150_vm3, %v1147_v8, %v1148_v45  ;;  %v1187_v16 = vrot.slane %v1145_v14, 6 }
 0x16e   : > { %v1153_v36 = vadd.f32 %v1152_v59, %v1103_v25  ;;  %v1154_v49 = vadd.f32 %v1151_v52, %v1104_v60  ;;  %v1159_v51 = vsel %vm1158_vm4, %v1156_v11, %v1157_v31  ;;  %v1160_v32 = vsel %vm1158_vm4, %v1155_v12, %v1156_v11 }
 0x16f   : > { %v1167_v1 = vsel %vm1166_vm5, %v1164_v47, %v1165_v28  ;;  %v1168_v43 = vsel %vm1166_vm5, %v1163_v4, %v1164_v47  ;;  %v1175_v21 = vsel %vm1174_vm6, %v1172_v38, %v1173_v62  ;;  %v1176_v48 = vsel %vm1174_vm6, %v1171_v55, %v1172_v38 }
 0x170   : > { %v1161_v34 = vadd.f32 %v1160_v32, %v1153_v36  ;;  %v1162_v35 = vadd.f32 %v1159_v51, %v1154_v49  ;;  %v1182_v44 = vsel %vm295_vm2, %v1180_v50, %v1181_v2  ;;  %v1183_v15 = vsel %vm295_vm2, %v1179_v26, %v1180_v50 }
 0x171   : > { %v1190_v63 = vsel %vm1189_vm7, %v1187_v16, %v1188_v61  ;;  %v1191_v10 = vsel %vm1189_vm7, %v1186_v23, %v1187_v16  ;;  %v1194_v4 = vstv %s408_s18 }
 0x172   : > { %v1169_v27 = vadd.f32 %v1168_v43, %v1161_v34  ;;  %v1170_v8 = vadd.f32 %v1167_v1, %v1162_v35 }
 0x174   : > { %v1177_v33 = vadd.f32 %v1176_v48, %v1169_v27  ;;  %v1178_v12 = vadd.f32 %v1175_v21, %v1170_v8 }
 0x176   : > { %v1184_v31 = vadd.f32 %v1183_v15, %v1177_v33  ;;  %v1185_v9 = vadd.f32 %v1182_v44, %v1178_v12 }
 0x178   : > { %v1192_v28 = vadd.f32 %v1191_v10, %v1184_v31  ;;  %v1193_v55 = vadd.f32 %v1190_v63, %v1185_v9 }
 0x17a   : > { %v1195_v46 = vadd.f32 %v1194_v4, %v1192_v28  ;;  %v1196_v62 = vadd.f32 %v1194_v4, %v1193_v55 }
 0x17c   : > { %v1437_v26 = vmul.f32 -1.442695, %v1195_v46  ;;  %v1438_v2 = vmul.f32 -1.442695, %v1196_v62 }
 0x17e   : > { %1531 = vpow2.f32 %v1437_v26 }
 0x17f   : > { %1533 = vpow2.f32 %v1438_v2 }
 0x188   : > { %v1532_v22 = vpop.eup %1531 }
 0x189   : > { %v1534_v54 = vpop.eup %1533  ;;  %v1203_v23 = vadd.f32 1.0, %v1532_v22 }
 0x18a   : > { %v1204_v53 = vadd.f32 1.0, %v1534_v54 }
 0x18b   : > { %1535 = vrcp.f32 %v1203_v23 }
 0x18c   : > { %1537 = vrcp.f32 %v1204_v53 }
 0x195   : > { %v1536_v24 = vpop.eup %1535 }
 0x196   : > { %v1538_v19 = vpop.eup %1537  ;;  %1209 = vst [vmem:[%s220_s5] sm:$0xff] %v1536_v24 }
 0x197   : > { %1210 = vst [vmem:[%s220_s5 + $0x8] sm:$0xff] %v1538_v19 }
 0x198   : > { %1597 = shalt.err (!%p1594_p8)
}
 0x199   : > { %s1598_s0 = scalar_lea.hbm %s3013_s24, 256  ;;  %s1602_s19 = scalar_lea.hbm %s3429_s6, 512 }
 0x19a   : > { %p1599_p4 = scmp.ne.s32.totalorder %s3013_s24, %s1598_s0  ;;  %p1603_p5 = scmp.lt.u32.totalorder %s3013_s24, %s3429_s6 }
 0x19b   : > { %p1604_p3 = scmp.lt.u32.totalorder %s1602_s19, %s1598_s0  ;;  %p1606_p12 = scmp.lt.u32.totalorder %s1598_s0, %s3013_s24 }
 0x19c   : > { %p1600_p10 = pnand %p1599_p4, %p3430_p2 }
 0x19d   : > { %p1605_p7 = por %p1604_p3, %p1603_p5 }
 0x19e   : > { %p1601_p11 = pneg %p1600_p10 }
 0x19f   : > { %p1607_p13 = por %p1606_p12, %p1605_p7 }
 0x1a1   : > { %p1608_p6 = pnand %p1607_p13, %p1601_p11 }
 0x1a3   : > { %1611 = shalt.err (!%p1608_p6)
}
 0x1a4   : > { %s1685_s17 = smov 128   ;;  %s1686_s21 = smov 8  }
 0x1a5   : > { %1452 = dma.vmem_to_hbm [thread:$0]  (%p3430_p2), %s3015_s13, 256, %s3013_s24, %s1212_s25, %s1685_s17, %s1685_s17, %s1686_s21  }
 0x1a6 PF: > { %s3431_s20 = sld [smem:[#allocation13_spill]]  ;;  %s3432_s22 = sld [smem:[#allocation20_spill]] }
 0x1a7   : > { %s3433_s15 = sld [smem:[#allocation18_spill]] }
 0x1ac   : > { %s1240_s29 = sand.u32 1, %s3431_s20   ;;  %p3434_p0 = scmp.ne.s32.totalorder %s3432_s22, 0 }
 0x1ad   : > { %p3435_p1 = scmp.ge.s32.totalorder %s3433_s15, 2  ;;  %s1241_s23 = scalar_lea.sflag [#allocation6], %s1240_s29 }
 0x1af   : > { %p1463_p9 = pnand %p3435_p1, %p3434_p0 }
 0x1b1   : > { %1645 = dma.done.wait (!%p1463_p9), %s1241_s23, 256  }
 0x1b2   : > { %1647 = vsyncadd (!%p1463_p9), %s1241_s23, 4294967040  ;;  %s21_s19 = sadd.s32 1, %s3433_s15   ;;  %s3436_s14 = sld [smem:[#allocation14_spill]] }
 0x1b3   : > { %p18_p8 = scmp.ge.s32.totalorder %s21_s19, 4   ;;  %s3437_s15 = sld [smem:[#allocation15_spill]] }
 0x1b4   : > { %s3438_s16 = sld [smem:[#allocation22_spill]]  ;;  %s3439_s17 = sld [smem:[#allocation17_spill]] }
 0x1b5   : > { %s3440_s18 = sld [smem:[#allocation21_spill]]  ;;  %20 = sbr.rel (!%p18_p8) target bundleno = 12 (0xc), region = 96 }
 0x1bc   :  { %1246 = vsyncpa [#allocation5], 1 }
 0x1bd   :  { %1248 = vsyncpa [#allocation5 + $0x1], 1 }
 0x1be   :  { %1249 = vsyncpa [#allocation6], 1 }
 0x1bf   :  { %1251 = vsyncpa [#allocation6 + $0x1], 1 }
 0x1c0   :  { %1252 = vsyncpa [#allocation7], 1 }
 0x1c1   :  { %1254 = vsyncpa [#allocation7 + $0x1], 1 }

</bundles_post_ra>
